<compile_context>
chip_gen: v5e
topology: v5e:2x2
jax: 0.10.0
libtpu: 0.0.40
codegen_flags: <defaults>
</compile_context>

<pallas_src>
import math

import jax
import jax.numpy as jnp
from jax.experimental import pallas as pl
from jax.experimental.pallas import tpu as pltpu

_NEG_INF = -1e9


def _vmem_capacity_bytes():
    """Physical per-core VMEM (v5e/v6e: 128 MiB, v7x: 64 MiB). Conservative fallback."""
    try:
        cap = getattr(pltpu.get_tpu_info(), "vmem_capacity_bytes", None)
        if cap:
            return int(cap)
    except Exception:
        pass
    return 64 * 1024 * 1024


_VMEM_CAP = _vmem_capacity_bytes()
# ~48 MiB scoped budget on v7x, ~96 MiB on v5e/v6e.
_VMEM_LIMIT = min((_VMEM_CAP * 3) // 4, 112 * 1024 * 1024)
# Smaller query tiles on v7x keep the (nh, TQ, S) f32 softmax temps well inside 64 MiB.
_MAX_ROW_TILE = 128 if _VMEM_CAP <= 96 * 1024 * 1024 else 256

# Single-buffer constant-index operands (second pipeline buffer is pure VMEM waste);
# flipped off automatically if this JAX version rejects pipeline_mode / Buffered(1).
_SINGLE_BUFFER_CONSTS = [True]


def _const_spec(shape):
    """BlockSpec for an operand whose block index never changes (weights / LN params)."""
    zero = (0,) * len(shape)
    idx = lambda *_: zero
    if _SINGLE_BUFFER_CONSTS[0]:
        try:
            return pl.BlockSpec(shape, idx, pipeline_mode=pl.Buffered(1))
        except Exception:
            _SINGLE_BUFFER_CONSTS[0] = False
    return pl.BlockSpec(shape, idx)


def _pick_tile(n, max_tile, multiple):
    """Largest divisor of n that is <= max_tile and a multiple of `multiple`
    (falls back to the full extent, which always satisfies the block-shape rules)."""
    if n <= max_tile:
        return n
    for t in range(max_tile, multiple - 1, -1):
        if n % t == 0 and t % multiple == 0:
            return t
    return n


def _layer_norm(v, g, b):
    # BERT-pytorch LayerNorm: gamma * (x - mean) / (unbiased_std + 1e-6) + beta
    h = v.shape[-1]
    mean = jnp.mean(v, axis=-1, keepdims=True)
    var = jnp.sum((v - mean) ** 2, axis=-1, keepdims=True) * (1.0 / (h - 1))
    # approx reciprocal -> EUP slot; ~1e-3 relative deviation vs the torch reference.
    inv = pl.reciprocal(jnp.sqrt(var) + 1e-6, approx=True)
    return g * (v - mean) * inv + b


# ------------------------- kernel 1: LN1 + fused QKV projection ------------------------
# The 1/sqrt(dh) attention scale is already folded into the Q columns of w/bias.

def _ln_qkv_kernel(x_ref, g_ref, b_ref, w_ref, bias_ref, q_ref, k_ref, v_ref):
    x = x_ref[0].astype(jnp.float32)                               # (TR, H)
    h = x.shape[-1]
    h1 = _layer_norm(x, g_ref[...], b_ref[...]).astype(jnp.bfloat16)
    qkv = (jnp.dot(h1, w_ref[...], preferred_element_type=jnp.float32)
           + bias_ref[...]).astype(jnp.bfloat16)                   # (TR, 3H)
    q_ref[0] = qkv[:, :h]                                          # lane-dense bf16 stores
    k_ref[0] = qkv[:, h:2 * h]
    v_ref[0] = qkv[:, 2 * h:]


# --------------- kernel 2: attention + out-proj + LN2 + (F-tiled) FFN -----------------

def _attn_ffn_kernel(x_ref, q_ref, k_ref, v_ref, bias_ref,
                     wo_ref, bo_ref, ln2g_ref, ln2b_ref,
                     w1_ref, b1_ref, w2_ref, b2_ref,
                     out_ref, xa_ref, h2_ref, acc_ref):
    f = pl.program_id(2)

    @pl.when(f == 0)
    def _attention():
        x = x_ref[0].astype(jnp.float32)                           # (TQ, H) residual input
        q = q_ref[0]                                               # (nh, TQ, dh) bf16, pre-scaled
        k = k_ref[0]                                               # (nh, S,  dh) bf16
        v = v_ref[0]                                               # (nh, S,  dh) bf16

        s = jnp.einsum('hqd,hkd->hqk', q, k,
                       preferred_element_type=jnp.float32)         # (nh, TQ, S)
        s = s + bias_ref[...]                                      # additive key-padding bias
        m = jnp.max(s, axis=-1, keepdims=True)
        e = jnp.exp(s - m)                                         # unnormalized, <= 1
        denom = jnp.sum(e, axis=-1, keepdims=True)
        # deferred normalization: rescale the small (nh, TQ, dh) context, not (nh, TQ, S)
        ctx = jnp.einsum('hqk,hkd->hqd', e.astype(v.dtype), v,
                         preferred_element_type=jnp.float32)
        ctx = (ctx * pl.reciprocal(denom, approx=True)).astype(jnp.bfloat16)

        # out-projection: accumulate per-head matmuls directly into one (TQ, H) f32 value
        # (no (nh, TQ, H) intermediate, no cross-head reduction afterwards).
        attn = bo_ref[...].astype(jnp.float32)
        for hh in range(ctx.shape[0]):
            attn = attn + jnp.dot(ctx[hh], wo_ref[hh],
                                  preferred_element_type=jnp.float32)

        xa = x + attn                                              # residual; dropout = identity
        xa_ref[...] = xa
        h2_ref[...] = _layer_norm(xa, ln2g_ref[...], ln2b_ref[...]).astype(jnp.bfloat16)
        acc_ref[...] = jnp.zeros_like(acc_ref)

    # ---- position-wise feed-forward for this F tile (accumulated over f) ----
    ff = jnp.dot(h2_ref[...], w1_ref[...],
                 preferred_element_type=jnp.float32) + b1_ref[...]
    # GELU (tanh approximation, as in BERT-pytorch)
    ff = 0.5 * ff * (1.0 + jnp.tanh(0.7978845608028654 * (ff + 0.044715 * ff * ff * ff)))
    acc_ref[...] = acc_ref[...] + jnp.dot(ff.astype(jnp.bfloat16), w2_ref[...],
                                          preferred_element_type=jnp.float32)

    @pl.when(f == pl.num_programs(2) - 1)
    def _finish():
        out_ref[0] = (xa_ref[...] + acc_ref[...] + b2_ref[...]).astype(out_ref.dtype)


def transformer_layer(x, attn_bias, p, n_heads):
    B, S, H = x.shape
    dh = H // n_heads
    F = p["w1"].shape[1]
    TR = _pick_tile(S, _MAX_ROW_TILE, 8)          # row / query tile

    # ---- LN1 + fused QKV: three separate lane-dense (B, S, H) bf16 outputs ----
    row_spec = pl.BlockSpec((1, TR, H), lambda b, i: (b, i, 0))
    q, k, v = pl.pallas_call(
        _ln_qkv_kernel,
        grid=(B, S // TR),
        in_specs=[
            row_spec,                                              # x tile
            _const_spec((1, H)), _const_spec((1, H)),              # ln1 gamma/beta
            _const_spec((H, 3 * H)), _const_spec((1, 3 * H)),      # fused Wqkv, bqkv
        ],
        out_specs=(pl.BlockSpec((1, TR, H), lambda b, i: (b, i, 0)),
                   pl.BlockSpec((1, TR, H), lambda b, i: (b, i, 0)),
                   pl.BlockSpec((1, TR, H), lambda b, i: (b, i, 0))),
        out_shape=(jax.ShapeDtypeStruct((B, S, H), jnp.bfloat16),
                   jax.ShapeDtypeStruct((B, S, H), jnp.bfloat16),
                   jax.ShapeDtypeStruct((B, S, H), jnp.bfloat16)),
        compiler_params=pltpu.CompilerParams(
            dimension_semantics=("parallel", "parallel"),
            vmem_limit_bytes=_VMEM_LIMIT),
    )(x, p["ln1_g"], p["ln1_b"], p["wqkv"], p["bqkv"])

    # Head layout (B, nh, S, dh) done once in XLA (pure layout plumbing; keeps the kernel
    # free of lane<->sublane relayouts and masked dh-wide stores).
    heads = lambda t: t.reshape(B, S, n_heads, dh).transpose(0, 2, 1, 3)
    qh, kh, vh = heads(q), heads(k), heads(v)
    wo_h = p["wo"].reshape(n_heads, dh, H)                          # per-head out-proj slabs

    # FFN weight residency: keep W1/W2 fully VMEM-resident (fetched once per call) when
    # they fit a quarter of the budget; otherwise stream them over the innermost F axis.
    # (Streaming trades extra weight HBM traffic per row tile for bounded VMEM — only
    # taken when residency is impossible, e.g. very large models on v7x.)
    ffn_weight_bytes = 2 * H * F * 2
    TF = F if ffn_weight_bytes <= _VMEM_LIMIT // 4 else _pick_tile(F, 1024, 128)

    TQ = TR
    return pl.pallas_call(
        _attn_ffn_kernel,
        grid=(B, S // TQ, F // TF),
        in_specs=[
            pl.BlockSpec((1, TQ, H), lambda b, i, f: (b, i, 0)),                # x (residual)
            pl.BlockSpec((1, n_heads, TQ, dh), lambda b, i, f: (b, 0, i, 0)),   # q tile
            pl.BlockSpec((1, n_heads, S, dh), lambda b, i, f: (b, 0, 0, 0)),    # k (full seq)
            pl.BlockSpec((1, n_heads, S, dh), lambda b, i, f: (b, 0, 0, 0)),    # v (full seq)
            pl.BlockSpec((1, 1, S), lambda b, i, f: (b, 0, 0)),                 # additive mask
            _const_spec((n_heads, dh, H)),                                      # Wo (head-major)
            _const_spec((1, H)),                                                # bo
            _const_spec((1, H)), _const_spec((1, H)),                           # ln2 gamma/beta
            pl.BlockSpec((H, TF), lambda b, i, f: (0, f)),                      # W1 (F-tiled)
            pl.BlockSpec((1, TF), lambda b, i, f: (0, f)),                      # b1 (F-tiled)
            pl.BlockSpec((TF, H), lambda b, i, f: (f, 0)),                      # W2 (F-tiled)
            _const_spec((1, H)),                                                # b2
        ],
        out_specs=pl.BlockSpec((1, TQ, H), lambda b, i, f: (b, i, 0)),
        out_shape=jax.ShapeDtypeStruct((B, S, H), jnp.float32),
        scratch_shapes=[
            pltpu.VMEM((TQ, H), jnp.float32),    # x + attention (residual carry)
            pltpu.VMEM((TQ, H), jnp.bfloat16),   # LN2 output (FFN lhs)
            pltpu.VMEM((TQ, H), jnp.float32),    # FFN accumulator over F tiles
        ],
        compiler_params=pltpu.CompilerParams(
            dimension_semantics=("parallel", "parallel", "arbitrary"),
            vmem_limit_bytes=_VMEM_LIMIT),
    )(x, qh, kh, vh, attn_bias, wo_h, p["bo"], p["ln2_g"], p["ln2_b"],
      p["w1"], p["b1"], p["w2"], p["b2"])


# ------------------------------------- output heads ------------------------------------

def _lm_head_kernel(x_ref, w_ref, b_ref, out_ref):
    out_ref[0] = (jnp.dot(x_ref[0].astype(jnp.bfloat16), w_ref[...],
                          preferred_element_type=jnp.float32) + b_ref[...]
                  ).astype(out_ref.dtype)


def bert_heads(x, wns, bns, wlm, blm):
    B, S, H = x.shape
    V = wlm.shape[1]
    TR = _pick_tile(S, _MAX_ROW_TILE, 8)
    # Pad the vocab to a multiple of the lane-dense tile so odd vocab sizes (e.g. 21128)
    # never fall back to a single full-V block; pad logits are sliced off before softmax.
    TV = 512 if V > 512 else V
    Vp = ((V + TV - 1) // TV) * TV
    if Vp != V:
        wlm = jnp.pad(wlm, ((0, 0), (0, Vp - V)))
        blm = jnp.pad(blm, ((0, 0), (0, Vp - V)))

    # Vocab axis outermost: each (H, TV) weight tile is DMA'd once and reused across
    # every (batch, row) tile; bf16 logits halve the (B, S, V) HBM write/read.
    lm_logits = pl.pallas_call(
        _lm_head_kernel,
        grid=(Vp // TV, B, S // TR),
        in_specs=[
            pl.BlockSpec((1, TR, H), lambda j, b, i: (b, i, 0)),
            pl.BlockSpec((H, TV), lambda j, b, i: (0, j)),
            pl.BlockSpec((1, TV), lambda j, b, i: (0, j)),
        ],
        out_specs=pl.BlockSpec((1, TR, TV), lambda j, b, i: (b, i, j)),
        out_shape=jax.ShapeDtypeStruct((B, S, Vp), jnp.bfloat16),
        compiler_params=pltpu.CompilerParams(
            dimension_semantics=("parallel", "parallel", "parallel"),
            vmem_limit_bytes=_VMEM_LIMIT),
    )(x, wlm, blm)

    # Final LogSoftmax (full-vocab row reduction) and the tiny (H, 2) NSP head stay in XLA.
    x2 = jax.nn.log_softmax(lm_logits[..., :V].astype(jnp.float32), axis=-1)
    ns_logits = x[:, 0, :] @ wns + bns
    x1 = jax.nn.log_softmax(ns_logits, axis=-1)
    return x1, x2


# ----------------------------- parameters & full forward -------------------------------

def make_params(key, vocab_size, hidden, n_layers, attn_heads, max_len=512):
    keys = jax.random.split(key, 4 + n_layers)
    scale = 0.02
    dh = hidden // attn_heads
    qscale = 1.0 / math.sqrt(dh)

    tok = jax.random.normal(keys[0], (vocab_size, hidden), jnp.float32) * scale
    tok = tok.at[0].set(0.0)                     # padding_idx = 0
    seg = jax.random.normal(keys[1], (3, hidden), jnp.float32) * scale
    seg = seg.at[0].set(0.0)                     # padding_idx = 0

    # sinusoidal positional embedding (fixed, not learned)
    pos = jnp.arange(max_len, dtype=jnp.float32)[:, None]
    div = jnp.exp(jnp.arange(0, hidden, 2, dtype=jnp.float32) * (-jnp.log(10000.0) / hidden))
    pe = jnp.zeros((max_len, hidden), jnp.float32)
    pe = pe.at[:, 0::2].set(jnp.sin(pos * div))
    pe = pe.at[:, 1::2].set(jnp.cos(pos * div))

    def linear(k, fan_in, fan_out):
        kw, kb = jax.random.split(k)
        w = jax.random.normal(kw, (fan_in, fan_out), jnp.float32) * scale
        b = jax.random.normal(kb, (1, fan_out), jnp.float32) * scale
        return w, b

    layers = []
    for li in range(n_layers):
        lk = jax.random.split(keys[4 + li], 4)
        wqkv, bqkv = linear(lk[0], hidden, 3 * hidden)   # fused Wq | Wk | Wv
        # fold the 1/sqrt(dh) attention scale into the Q columns (removes a per-tile
        # VALU multiply+select from kernel 1; mathematically identical).
        qs = jnp.concatenate([jnp.full((hidden,), qscale, jnp.float32),
                              jnp.ones((2 * hidden,), jnp.float32)])
        wqkv = (wqkv * qs).astype(jnp.bfloat16)
        bqkv = bqkv * qs
        wo, bo = linear(lk[1], hidden, hidden)
        w1, b1 = linear(lk[2], hidden, 4 * hidden)
        w2, b2 = linear(lk[3], 4 * hidden, hidden)
        layers.append(dict(
            ln1_g=jnp.ones((1, hidden), jnp.float32), ln1_b=jnp.zeros((1, hidden), jnp.float32),
            wqkv=wqkv, bqkv=bqkv,
            wo=wo.astype(jnp.bfloat16), bo=bo,
            ln2_g=jnp.ones((1, hidden), jnp.float32), ln2_b=jnp.zeros((1, hidden), jnp.float32),
            w1=w1.astype(jnp.bfloat16), b1=b1,
            w2=w2.astype(jnp.bfloat16), b2=b2))

    wns, bns = linear(keys[2], hidden, 2)                            # tiny NSP head, f32/XLA
    wlm, blm = linear(keys[3], hidden, vocab_size)
    return dict(tok=tok, seg=seg, pe=pe, layers=layers,
                wns=wns, bns=bns, wlm=wlm.astype(jnp.bfloat16), blm=blm)


def my_chinese_bert_forward(params, x, segment_info, attn_heads):
    B, S = x.shape
    # key-padding mask as an additive bias (0 = attend, -1e9 = padding); replaces the
    # reference's materialized (B, 1, S, S) mask with identical softmax behavior.
    attn_bias = jnp.where(x > 0, 0.0, _NEG_INF).astype(jnp.float32)[:, None, :]
    # embedding: token + positional + segment (dropout = identity, eval mode); XLA gathers.
    h = params["tok"][x] + params["pe"][None, :S, :] + params["seg"][segment_info]
    for p in params["layers"]:
        h = transformer_layer(h, attn_bias, p, attn_heads)
    return bert_heads(h, params["wns"], params["bns"], params["wlm"], params["blm"])


# ----------------------------------------- main -----------------------------------------

if __name__ == "__main__":
    VOCAB, HIDDEN, N_LAYERS, HEADS = 128, 32, 2, 4
    B, S = 2, 8

    key = jax.random.PRNGKey(0)
    kp, kx = jax.random.split(key, 2)
    params = make_params(kp, VOCAB, HIDDEN, N_LAYERS, HEADS)

    x = jax.random.randint(kx, (B, S), 1, VOCAB, dtype=jnp.int32)
    x = x.at[:, -2:].set(0)                      # padding tokens to exercise the mask
    segment_info = jnp.concatenate(
        [jnp.ones((B, S // 2), jnp.int32), 2 * jnp.ones((B, S // 2), jnp.int32)], axis=1)
    segment_info = jnp.where(x > 0, segment_info, 0)

    def run():
        fwd = jax.jit(my_chinese_bert_forward, static_argnums=(3,))
        out = fwd(params, x, segment_info, HEADS)
        jax.block_until_ready(out)
        return out

    try:
        x1, x2 = run()
    except Exception:
        # Fall back to default double-buffered constant operands if this JAX/Mosaic
        # version does not accept pipeline_mode=pl.Buffered(1).
        _SINGLE_BUFFER_CONSTS[0] = False
        x1, x2 = run()

    assert x1.shape == (B, 2) and x2.shape == (B, S, VOCAB)
    assert x1.dtype == jnp.float32 and x2.dtype == jnp.float32
    print("KERNEL_OK")
</pallas_src>

<mosaic_0001>
module attributes {stable_mosaic.version = 11 : i64} {
  func.func @_ln_qkv_kernel(%arg0: i32, %arg1: i32, %arg2: memref<1x8x32xf32, #tpu.memory_space<vmem>>, %arg3: memref<1x32xf32, #tpu.memory_space<vmem>>, %arg4: memref<1x32xf32, #tpu.memory_space<vmem>>, %arg5: memref<32x96xbf16, #tpu.memory_space<vmem>>, %arg6: memref<1x96xf32, #tpu.memory_space<vmem>>, %arg7: memref<1x8x32xbf16, #tpu.memory_space<vmem>>, %arg8: memref<1x8x32xbf16, #tpu.memory_space<vmem>>, %arg9: memref<1x8x32xbf16, #tpu.memory_space<vmem>>) attributes {dimension_semantics = [#tpu.dimension_semantics<parallel>, #tpu.dimension_semantics<parallel>], iteration_bounds = array<i64: 2, 1>, scalar_prefetch = 0 : i64, scratch_operands = 0 : i64, tpu.core_type = #tpu.core_type<tc>, window_params = [{transform_indices = @transform_0, window_bounds = array<i64: 1, 8, 32>}, {pipeline_mode = #tpu.pipeline_mode<synchronous>, transform_indices = @transform_1, window_bounds = array<i64: 1, 32>}, {pipeline_mode = #tpu.pipeline_mode<synchronous>, transform_indices = @transform_2, window_bounds = array<i64: 1, 32>}, {pipeline_mode = #tpu.pipeline_mode<synchronous>, transform_indices = @transform_3, window_bounds = array<i64: 32, 96>}, {pipeline_mode = #tpu.pipeline_mode<synchronous>, transform_indices = @transform_4, window_bounds = array<i64: 1, 96>}, {transform_indices = @transform_5, window_bounds = array<i64: 1, 8, 32>}, {transform_indices = @transform_6, window_bounds = array<i64: 1, 8, 32>}, {transform_indices = @transform_7, window_bounds = array<i64: 1, 8, 32>}]} {
    %c0 = arith.constant 0 : index
    %c0_0 = arith.constant 0 : index
    %c0_1 = arith.constant 0 : index
    %0 = vector.load %arg2[%c0, %c0_0, %c0_1] : memref<1x8x32xf32, #tpu.memory_space<vmem>>, vector<1x8x32xf32>
    %1 = vector.shape_cast %0 : vector<1x8x32xf32> to vector<8x32xf32>
    %c0_2 = arith.constant 0 : index
    %c0_3 = arith.constant 0 : index
    %2 = vector.load %arg3[%c0_2, %c0_3] : memref<1x32xf32, #tpu.memory_space<vmem>>, vector<1x32xf32>
    %c0_4 = arith.constant 0 : index
    %c0_5 = arith.constant 0 : index
    %3 = vector.load %arg4[%c0_4, %c0_5] : memref<1x32xf32, #tpu.memory_space<vmem>>, vector<1x32xf32>
    %cst = arith.constant dense<0.000000e+00> : vector<8xf32>
    %4 = vector.multi_reduction <add>, %1, %cst [1] : vector<8x32xf32> to vector<8xf32>
    %5 = vector.shape_cast %4 : vector<8xf32> to vector<8x1xf32>
    %cst_6 = arith.constant 3.200000e+01 : f32
    %6 = vector.broadcast %cst_6 : f32 to vector<8x1xf32>
    %7 = arith.divf %5, %6 : vector<8x1xf32>
    %8 = vector.broadcast %7 : vector<8x1xf32> to vector<8x32xf32>
    %9 = arith.subf %1, %8 : vector<8x32xf32>
    %10 = arith.mulf %9, %9 : vector<8x32xf32>
    %cst_7 = arith.constant dense<0.000000e+00> : vector<8xf32>
    %11 = vector.multi_reduction <add>, %10, %cst_7 [1] : vector<8x32xf32> to vector<8xf32>
    %12 = vector.shape_cast %11 : vector<8xf32> to vector<8x1xf32>
    %cst_8 = arith.constant 0.0322580636 : f32
    %13 = vector.broadcast %cst_8 : f32 to vector<8x1xf32>
    %14 = arith.mulf %12, %13 : vector<8x1xf32>
    %15 = math.sqrt %14 : vector<8x1xf32>
    %cst_9 = arith.constant 9.99999997E-7 : f32
    %16 = vector.broadcast %cst_9 : f32 to vector<8x1xf32>
    %17 = arith.addf %15, %16 : vector<8x1xf32>
    %18 = tpu.reciprocal %17 {approx = true} : vector<8x1xf32> -> vector<8x1xf32>
    %19 = vector.broadcast %7 : vector<8x1xf32> to vector<8x32xf32>
    %20 = arith.subf %1, %19 : vector<8x32xf32>
    %21 = vector.broadcast %2 : vector<1x32xf32> to vector<8x32xf32>
    %22 = arith.mulf %21, %20 : vector<8x32xf32>
    %23 = vector.broadcast %18 : vector<8x1xf32> to vector<8x32xf32>
    %24 = arith.mulf %22, %23 : vector<8x32xf32>
    %25 = vector.broadcast %3 : vector<1x32xf32> to vector<8x32xf32>
    %26 = arith.addf %24, %25 : vector<8x32xf32>
    %27 = arith.truncf %26 : vector<8x32xf32> to vector<8x32xbf16>
    %c0_10 = arith.constant 0 : index
    %c0_11 = arith.constant 0 : index
    %28 = vector.load %arg5[%c0_10, %c0_11] : memref<32x96xbf16, #tpu.memory_space<vmem>>, vector<32x96xbf16>
    %cst_12 = arith.constant dense<0.000000e+00> : vector<8x96xf32>
    %29 = tpu.matmul %27, %28, %cst_12 {dimension_numbers = #tpu.dot_dimension_numbers<[1], [0], [0], [1], [0, 0, 1, 1], [], []>} : vector<8x32xbf16>, vector<32x96xbf16>, vector<8x96xf32> -> vector<8x96xf32>
    %c0_13 = arith.constant 0 : index
    %c0_14 = arith.constant 0 : index
    %30 = vector.load %arg6[%c0_13, %c0_14] : memref<1x96xf32, #tpu.memory_space<vmem>>, vector<1x96xf32>
    %31 = vector.broadcast %30 : vector<1x96xf32> to vector<8x96xf32>
    %32 = arith.addf %29, %31 : vector<8x96xf32>
    %33 = arith.truncf %32 : vector<8x96xf32> to vector<8x96xbf16>
    %34 = vector.extract_strided_slice %33 {offsets = [0, 0], sizes = [8, 32], strides = [1, 1]} : vector<8x96xbf16> to vector<8x32xbf16>
    %c0_15 = arith.constant 0 : index
    %c0_16 = arith.constant 0 : index
    %c0_17 = arith.constant 0 : index
    %35 = vector.load %arg7[%c0_15, %c0_16, %c0_17] : memref<1x8x32xbf16, #tpu.memory_space<vmem>>, vector<1x8x32xbf16>
    %36 = vector.shape_cast %35 : vector<1x8x32xbf16> to vector<8x32xbf16>
    %37 = vector.shape_cast %34 : vector<8x32xbf16> to vector<1x8x32xbf16>
    tpu.vector_store %arg7[%c0_15, %c0_16, %c0_17], %37 {strides = array<i32>} : memref<1x8x32xbf16, #tpu.memory_space<vmem>>, vector<1x8x32xbf16>,
    %38 = vector.extract_strided_slice %33 {offsets = [0, 32], sizes = [8, 32], strides = [1, 1]} : vector<8x96xbf16> to vector<8x32xbf16>
    %c0_18 = arith.constant 0 : index
    %c0_19 = arith.constant 0 : index
    %c0_20 = arith.constant 0 : index
    %39 = vector.load %arg8[%c0_18, %c0_19, %c0_20] : memref<1x8x32xbf16, #tpu.memory_space<vmem>>, vector<1x8x32xbf16>
    %40 = vector.shape_cast %39 : vector<1x8x32xbf16> to vector<8x32xbf16>
    %41 = vector.shape_cast %38 : vector<8x32xbf16> to vector<1x8x32xbf16>
    tpu.vector_store %arg8[%c0_18, %c0_19, %c0_20], %41 {strides = array<i32>} : memref<1x8x32xbf16, #tpu.memory_space<vmem>>, vector<1x8x32xbf16>,
    %42 = vector.extract_strided_slice %33 {offsets = [0, 64], sizes = [8, 32], strides = [1, 1]} : vector<8x96xbf16> to vector<8x32xbf16>
    %c0_21 = arith.constant 0 : index
    %c0_22 = arith.constant 0 : index
    %c0_23 = arith.constant 0 : index
    %43 = vector.load %arg9[%c0_21, %c0_22, %c0_23] : memref<1x8x32xbf16, #tpu.memory_space<vmem>>, vector<1x8x32xbf16>
    %44 = vector.shape_cast %43 : vector<1x8x32xbf16> to vector<8x32xbf16>
    %45 = vector.shape_cast %42 : vector<8x32xbf16> to vector<1x8x32xbf16>
    tpu.vector_store %arg9[%c0_21, %c0_22, %c0_23], %45 {strides = array<i32>} : memref<1x8x32xbf16, #tpu.memory_space<vmem>>, vector<1x8x32xbf16>,
    return
  }
  func.func @transform_0(%arg0: i32, %arg1: i32) -> (i32, i32, i32) {
    %c0_i32 = arith.constant 0 : i32
    %c0_i32_0 = arith.constant 0 : i32
    return %arg0, %arg1, %c0_i32 : i32, i32, i32
  }
  func.func @transform_1(%arg0: i32, %arg1: i32) -> (i32, i32) {
    %c0_i32 = arith.constant 0 : i32
    %c0_i32_0 = arith.constant 0 : i32
    %c0_i32_1 = arith.constant 0 : i32
    return %c0_i32, %c0_i32_0 : i32, i32
  }
  func.func @transform_2(%arg0: i32, %arg1: i32) -> (i32, i32) {
    %c0_i32 = arith.constant 0 : i32
    %c0_i32_0 = arith.constant 0 : i32
    %c0_i32_1 = arith.constant 0 : i32
    return %c0_i32, %c0_i32_0 : i32, i32
  }
  func.func @transform_3(%arg0: i32, %arg1: i32) -> (i32, i32) {
    %c0_i32 = arith.constant 0 : i32
    %c0_i32_0 = arith.constant 0 : i32
    %c0_i32_1 = arith.constant 0 : i32
    return %c0_i32, %c0_i32_0 : i32, i32
  }
  func.func @transform_4(%arg0: i32, %arg1: i32) -> (i32, i32) {
    %c0_i32 = arith.constant 0 : i32
    %c0_i32_0 = arith.constant 0 : i32
    %c0_i32_1 = arith.constant 0 : i32
    return %c0_i32, %c0_i32_0 : i32, i32
  }
  func.func @transform_5(%arg0: i32, %arg1: i32) -> (i32, i32, i32) {
    %c0_i32 = arith.constant 0 : i32
    %c0_i32_0 = arith.constant 0 : i32
    return %arg0, %arg1, %c0_i32 : i32, i32, i32
  }
  func.func @transform_6(%arg0: i32, %arg1: i32) -> (i32, i32, i32) {
    %c0_i32 = arith.constant 0 : i32
    %c0_i32_0 = arith.constant 0 : i32
    return %arg0, %arg1, %c0_i32 : i32, i32, i32
  }
  func.func @transform_7(%arg0: i32, %arg1: i32) -> (i32, i32, i32) {
    %c0_i32 = arith.constant 0 : i32
    %c0_i32_0 = arith.constant 0 : i32
    return %arg0, %arg1, %c0_i32 : i32, i32, i32
  }
}

module attributes {stable_mosaic.version = 11 : i64} {
  func.func @_attn_ffn_kernel(%arg0: i32, %arg1: i32, %arg2: i32, %arg3: memref<1x8x32xf32, #tpu.memory_space<vmem>>, %arg4: memref<1x4x8x8xbf16, #tpu.memory_space<vmem>>, %arg5: memref<1x4x8x8xbf16, #tpu.memory_space<vmem>>, %arg6: memref<1x4x8x8xbf16, #tpu.memory_space<vmem>>, %arg7: memref<1x1x8xf32, #tpu.memory_space<vmem>>, %arg8: memref<4x8x32xbf16, #tpu.memory_space<vmem>>, %arg9: memref<1x32xf32, #tpu.memory_space<vmem>>, %arg10: memref<1x32xf32, #tpu.memory_space<vmem>>, %arg11: memref<1x32xf32, #tpu.memory_space<vmem>>, %arg12: memref<32x128xbf16, #tpu.memory_space<vmem>>, %arg13: memref<1x128xf32, #tpu.memory_space<vmem>>, %arg14: memref<128x32xbf16, #tpu.memory_space<vmem>>, %arg15: memref<1x32xf32, #tpu.memory_space<vmem>>, %arg16: memref<1x8x32xf32, #tpu.memory_space<vmem>>, %arg17: memref<8x32xf32, #tpu.memory_space<vmem>>, %arg18: memref<8x32xbf16, #tpu.memory_space<vmem>>, %arg19: memref<8x32xf32, #tpu.memory_space<vmem>>) attributes {dimension_semantics = [#tpu.dimension_semantics<parallel>, #tpu.dimension_semantics<parallel>, #tpu.dimension_semantics<arbitrary>], iteration_bounds = array<i64: 2, 1, 1>, scalar_prefetch = 0 : i64, scratch_operands = 3 : i64, tpu.core_type = #tpu.core_type<tc>, window_params = [{transform_indices = @transform_0, window_bounds = array<i64: 1, 8, 32>}, {transform_indices = @transform_1, window_bounds = array<i64: 1, 4, 8, 8>}, {transform_indices = @transform_2, window_bounds = array<i64: 1, 4, 8, 8>}, {transform_indices = @transform_3, window_bounds = array<i64: 1, 4, 8, 8>}, {transform_indices = @transform_4, window_bounds = array<i64: 1, 1, 8>}, {pipeline_mode = #tpu.pipeline_mode<synchronous>, transform_indices = @transform_5, window_bounds = array<i64: 4, 8, 32>}, {pipeline_mode = #tpu.pipeline_mode<synchronous>, transform_indices = @transform_6, window_bounds = array<i64: 1, 32>}, {pipeline_mode = #tpu.pipeline_mode<synchronous>, transform_indices = @transform_7, window_bounds = array<i64: 1, 32>}, {pipeline_mode = #tpu.pipeline_mode<synchronous>, transform_indices = @transform_8, window_bounds = array<i64: 1, 32>}, {transform_indices = @transform_9, window_bounds = array<i64: 32, 128>}, {transform_indices = @transform_10, window_bounds = array<i64: 1, 128>}, {transform_indices = @transform_11, window_bounds = array<i64: 128, 32>}, {pipeline_mode = #tpu.pipeline_mode<synchronous>, transform_indices = @transform_12, window_bounds = array<i64: 1, 32>}, {transform_indices = @transform_13, window_bounds = array<i64: 1, 8, 32>}]} {
    %c0_i32 = arith.constant 0 : i32
    %0 = arith.cmpi eq, %arg2, %c0_i32 : i32
    %1 = arith.extui %0 : i1 to i32
    %c0_i32_0 = arith.constant 0 : i32
    %2 = arith.cmpi ne, %1, %c0_i32_0 : i32
    scf.if %2 {
      %c0_19 = arith.constant 0 : index
      %c0_20 = arith.constant 0 : index
      %c0_21 = arith.constant 0 : index
      %31 = vector.load %arg3[%c0_19, %c0_20, %c0_21] : memref<1x8x32xf32, #tpu.memory_space<vmem>>, vector<1x8x32xf32>
      %32 = vector.shape_cast %31 : vector<1x8x32xf32> to vector<8x32xf32>
      %c0_22 = arith.constant 0 : index
      %c0_23 = arith.constant 0 : index
      %c0_24 = arith.constant 0 : index
      %c0_25 = arith.constant 0 : index
      %33 = vector.load %arg4[%c0_22, %c0_23, %c0_24, %c0_25] : memref<1x4x8x8xbf16, #tpu.memory_space<vmem>>, vector<1x4x8x8xbf16>
      %34 = vector.shape_cast %33 : vector<1x4x8x8xbf16> to vector<4x8x8xbf16>
      %c0_26 = arith.constant 0 : index
      %c0_27 = arith.constant 0 : index
      %c0_28 = arith.constant 0 : index
      %c0_29 = arith.constant 0 : index
      %35 = vector.load %arg5[%c0_26, %c0_27, %c0_28, %c0_29] : memref<1x4x8x8xbf16, #tpu.memory_space<vmem>>, vector<1x4x8x8xbf16>
      %36 = vector.shape_cast %35 : vector<1x4x8x8xbf16> to vector<4x8x8xbf16>
      %c0_30 = arith.constant 0 : index
      %c0_31 = arith.constant 0 : index
      %c0_32 = arith.constant 0 : index
      %c0_33 = arith.constant 0 : index
      %37 = vector.load %arg6[%c0_30, %c0_31, %c0_32, %c0_33] : memref<1x4x8x8xbf16, #tpu.memory_space<vmem>>, vector<1x4x8x8xbf16>
      %38 = vector.shape_cast %37 : vector<1x4x8x8xbf16> to vector<4x8x8xbf16>
      "tpu.trace_start"() <{level = 10 : i32, message = "hqd,hkd->hqk"}> : () -> ()
      %cst_34 = arith.constant dense<0.000000e+00> : vector<4x8x8xf32>
      %39 = tpu.matmul %34, %36, %cst_34 {dimension_numbers = #tpu.dot_dimension_numbers<[2], [2], [1], [1], [0, 0, 0, 1, 1, 1], [0], [0]>} : vector<4x8x8xbf16>, vector<4x8x8xbf16>, vector<4x8x8xf32> -> vector<4x8x8xf32>
      "tpu.trace_stop"() : () -> ()
      %c0_35 = arith.constant 0 : index
      %c0_36 = arith.constant 0 : index
      %c0_37 = arith.constant 0 : index
      %40 = vector.load %arg7[%c0_35, %c0_36, %c0_37] : memref<1x1x8xf32, #tpu.memory_space<vmem>>, vector<1x1x8xf32>
      %41 = vector.broadcast %40 : vector<1x1x8xf32> to vector<4x8x8xf32>
      %42 = arith.addf %39, %41 : vector<4x8x8xf32>
      %cst_38 = arith.constant dense<0xFF800000> : vector<4x8xf32>
      %43 = vector.multi_reduction <maximumf>, %42, %cst_38 [2] : vector<4x8x8xf32> to vector<4x8xf32>
      %44 = vector.shape_cast %43 : vector<4x8xf32> to vector<4x8x1xf32>
      %45 = vector.broadcast %44 : vector<4x8x1xf32> to vector<4x8x8xf32>
      %46 = arith.subf %42, %45 : vector<4x8x8xf32>
      %47 = math.exp %46 : vector<4x8x8xf32>
      %cst_39 = arith.constant dense<0.000000e+00> : vector<4x8xf32>
      %48 = vector.multi_reduction <add>, %47, %cst_39 [2] : vector<4x8x8xf32> to vector<4x8xf32>
      %49 = vector.shape_cast %48 : vector<4x8xf32> to vector<4x8x1xf32>
      %50 = arith.truncf %47 : vector<4x8x8xf32> to vector<4x8x8xbf16>
      "tpu.trace_start"() <{level = 10 : i32, message = "hqk,hkd->hqd"}> : () -> ()
      %cst_40 = arith.constant dense<0.000000e+00> : vector<4x8x8xf32>
      %51 = tpu.matmul %50, %38, %cst_40 {dimension_numbers = #tpu.dot_dimension_numbers<[2], [1], [1], [2], [0, 0, 0, 1, 1, 2], [0], [0]>} : vector<4x8x8xbf16>, vector<4x8x8xbf16>, vector<4x8x8xf32> -> vector<4x8x8xf32>
      "tpu.trace_stop"() : () -> ()
      %52 = tpu.reciprocal %49 {approx = true} : vector<4x8x1xf32> -> vector<4x8x1xf32>
      %53 = vector.broadcast %52 : vector<4x8x1xf32> to vector<4x8x8xf32>
      %54 = arith.mulf %51, %53 : vector<4x8x8xf32>
      %55 = arith.truncf %54 : vector<4x8x8xf32> to vector<4x8x8xbf16>
      %c0_41 = arith.constant 0 : index
      %c0_42 = arith.constant 0 : index
      %56 = vector.load %arg9[%c0_41, %c0_42] : memref<1x32xf32, #tpu.memory_space<vmem>>, vector<1x32xf32>
      %57 = vector.extract_strided_slice %55 {offsets = [0, 0, 0], sizes = [1, 8, 8], strides = [1, 1, 1]} : vector<4x8x8xbf16> to vector<1x8x8xbf16>
      %58 = vector.shape_cast %57 : vector<1x8x8xbf16> to vector<8x8xbf16>
      %c0_43 = arith.constant 0 : index
      %c0_44 = arith.constant 0 : index
      %c0_45 = arith.constant 0 : index
      %59 = vector.load %arg8[%c0_43, %c0_44, %c0_45] : memref<4x8x32xbf16, #tpu.memory_space<vmem>>, vector<1x8x32xbf16>
      %60 = vector.shape_cast %59 : vector<1x8x32xbf16> to vector<8x32xbf16>
      %cst_46 = arith.constant dense<0.000000e+00> : vector<8x32xf32>
      %61 = tpu.matmul %58, %60, %cst_46 {dimension_numbers = #tpu.dot_dimension_numbers<[1], [0], [0], [1], [0, 0, 1, 1], [], []>} : vector<8x8xbf16>, vector<8x32xbf16>, vector<8x32xf32> -> vector<8x32xf32>
      %62 = vector.broadcast %56 : vector<1x32xf32> to vector<8x32xf32>
      %63 = arith.addf %62, %61 : vector<8x32xf32>
      %64 = vector.extract_strided_slice %55 {offsets = [1, 0, 0], sizes = [1, 8, 8], strides = [1, 1, 1]} : vector<4x8x8xbf16> to vector<1x8x8xbf16>
      %65 = vector.shape_cast %64 : vector<1x8x8xbf16> to vector<8x8xbf16>
      %c1 = arith.constant 1 : index
      %c0_47 = arith.constant 0 : index
      %c0_48 = arith.constant 0 : index
      %66 = vector.load %arg8[%c1, %c0_47, %c0_48] : memref<4x8x32xbf16, #tpu.memory_space<vmem>>, vector<1x8x32xbf16>
      %67 = vector.shape_cast %66 : vector<1x8x32xbf16> to vector<8x32xbf16>
      %cst_49 = arith.constant dense<0.000000e+00> : vector<8x32xf32>
      %68 = tpu.matmul %65, %67, %cst_49 {dimension_numbers = #tpu.dot_dimension_numbers<[1], [0], [0], [1], [0, 0, 1, 1], [], []>} : vector<8x8xbf16>, vector<8x32xbf16>, vector<8x32xf32> -> vector<8x32xf32>
      %69 = arith.addf %63, %68 : vector<8x32xf32>
      %70 = vector.extract_strided_slice %55 {offsets = [2, 0, 0], sizes = [1, 8, 8], strides = [1, 1, 1]} : vector<4x8x8xbf16> to vector<1x8x8xbf16>
      %71 = vector.shape_cast %70 : vector<1x8x8xbf16> to vector<8x8xbf16>
      %c2 = arith.constant 2 : index
      %c0_50 = arith.constant 0 : index
      %c0_51 = arith.constant 0 : index
      %72 = vector.load %arg8[%c2, %c0_50, %c0_51] : memref<4x8x32xbf16, #tpu.memory_space<vmem>>, vector<1x8x32xbf16>
      %73 = vector.shape_cast %72 : vector<1x8x32xbf16> to vector<8x32xbf16>
      %cst_52 = arith.constant dense<0.000000e+00> : vector<8x32xf32>
      %74 = tpu.matmul %71, %73, %cst_52 {dimension_numbers = #tpu.dot_dimension_numbers<[1], [0], [0], [1], [0, 0, 1, 1], [], []>} : vector<8x8xbf16>, vector<8x32xbf16>, vector<8x32xf32> -> vector<8x32xf32>
      %75 = arith.addf %69, %74 : vector<8x32xf32>
      %76 = vector.extract_strided_slice %55 {offsets = [3, 0, 0], sizes = [1, 8, 8], strides = [1, 1, 1]} : vector<4x8x8xbf16> to vector<1x8x8xbf16>
      %77 = vector.shape_cast %76 : vector<1x8x8xbf16> to vector<8x8xbf16>
      %c3 = arith.constant 3 : index
      %c0_53 = arith.constant 0 : index
      %c0_54 = arith.constant 0 : index
      %78 = vector.load %arg8[%c3, %c0_53, %c0_54] : memref<4x8x32xbf16, #tpu.memory_space<vmem>>, vector<1x8x32xbf16>
      %79 = vector.shape_cast %78 : vector<1x8x32xbf16> to vector<8x32xbf16>
      %cst_55 = arith.constant dense<0.000000e+00> : vector<8x32xf32>
      %80 = tpu.matmul %77, %79, %cst_55 {dimension_numbers = #tpu.dot_dimension_numbers<[1], [0], [0], [1], [0, 0, 1, 1], [], []>} : vector<8x8xbf16>, vector<8x32xbf16>, vector<8x32xf32> -> vector<8x32xf32>
      %81 = arith.addf %75, %80 : vector<8x32xf32>
      %82 = arith.addf %32, %81 : vector<8x32xf32>
      %c0_56 = arith.constant 0 : index
      %c0_57 = arith.constant 0 : index
      %83 = vector.load %arg17[%c0_56, %c0_57] : memref<8x32xf32, #tpu.memory_space<vmem>>, vector<8x32xf32>
      tpu.vector_store %arg17[%c0_56, %c0_57], %82 {strides = array<i32>} : memref<8x32xf32, #tpu.memory_space<vmem>>, vector<8x32xf32>,
      %c0_58 = arith.constant 0 : index
      %c0_59 = arith.constant 0 : index
      %84 = vector.load %arg10[%c0_58, %c0_59] : memref<1x32xf32, #tpu.memory_space<vmem>>, vector<1x32xf32>
      %c0_60 = arith.constant 0 : index
      %c0_61 = arith.constant 0 : index
      %85 = vector.load %arg11[%c0_60, %c0_61] : memref<1x32xf32, #tpu.memory_space<vmem>>, vector<1x32xf32>
      %cst_62 = arith.constant dense<0.000000e+00> : vector<8xf32>
      %86 = vector.multi_reduction <add>, %82, %cst_62 [1] : vector<8x32xf32> to vector<8xf32>
      %87 = vector.shape_cast %86 : vector<8xf32> to vector<8x1xf32>
      %cst_63 = arith.constant 3.200000e+01 : f32
      %88 = vector.broadcast %cst_63 : f32 to vector<8x1xf32>
      %89 = arith.divf %87, %88 : vector<8x1xf32>
      %90 = vector.broadcast %89 : vector<8x1xf32> to vector<8x32xf32>
      %91 = arith.subf %82, %90 : vector<8x32xf32>
      %92 = arith.mulf %91, %91 : vector<8x32xf32>
      %cst_64 = arith.constant dense<0.000000e+00> : vector<8xf32>
      %93 = vector.multi_reduction <add>, %92, %cst_64 [1] : vector<8x32xf32> to vector<8xf32>
      %94 = vector.shape_cast %93 : vector<8xf32> to vector<8x1xf32>
      %cst_65 = arith.constant 0.0322580636 : f32
      %95 = vector.broadcast %cst_65 : f32 to vector<8x1xf32>
      %96 = arith.mulf %94, %95 : vector<8x1xf32>
      %97 = math.sqrt %96 : vector<8x1xf32>
      %cst_66 = arith.constant 9.99999997E-7 : f32
      %98 = vector.broadcast %cst_66 : f32 to vector<8x1xf32>
      %99 = arith.addf %97, %98 : vector<8x1xf32>
      %100 = tpu.reciprocal %99 {approx = true} : vector<8x1xf32> -> vector<8x1xf32>
      %101 = vector.broadcast %89 : vector<8x1xf32> to vector<8x32xf32>
      %102 = arith.subf %82, %101 : vector<8x32xf32>
      %103 = vector.broadcast %84 : vector<1x32xf32> to vector<8x32xf32>
      %104 = arith.mulf %103, %102 : vector<8x32xf32>
      %105 = vector.broadcast %100 : vector<8x1xf32> to vector<8x32xf32>
      %106 = arith.mulf %104, %105 : vector<8x32xf32>
      %107 = vector.broadcast %85 : vector<1x32xf32> to vector<8x32xf32>
      %108 = arith.addf %106, %107 : vector<8x32xf32>
      %109 = arith.truncf %108 : vector<8x32xf32> to vector<8x32xbf16>
      %c0_67 = arith.constant 0 : index
      %c0_68 = arith.constant 0 : index
      %110 = vector.load %arg18[%c0_67, %c0_68] : memref<8x32xbf16, #tpu.memory_space<vmem>>, vector<8x32xbf16>
      tpu.vector_store %arg18[%c0_67, %c0_68], %109 {strides = array<i32>} : memref<8x32xbf16, #tpu.memory_space<vmem>>, vector<8x32xbf16>,
      %cst_69 = arith.constant 0.000000e+00 : f32
      %111 = vector.broadcast %cst_69 : f32 to vector<8x32xf32>
      %c0_70 = arith.constant 0 : index
      %c0_71 = arith.constant 0 : index
      %112 = vector.load %arg19[%c0_70, %c0_71] : memref<8x32xf32, #tpu.memory_space<vmem>>, vector<8x32xf32>
      tpu.vector_store %arg19[%c0_70, %c0_71], %111 {strides = array<i32>} : memref<8x32xf32, #tpu.memory_space<vmem>>, vector<8x32xf32>,
    } else {
    }
    %c0 = arith.constant 0 : index
    %c0_1 = arith.constant 0 : index
    %3 = vector.load %arg18[%c0, %c0_1] : memref<8x32xbf16, #tpu.memory_space<vmem>>, vector<8x32xbf16>
    %c0_2 = arith.constant 0 : index
    %c0_3 = arith.constant 0 : index
    %4 = vector.load %arg12[%c0_2, %c0_3] : memref<32x128xbf16, #tpu.memory_space<vmem>>, vector<32x128xbf16>
    %cst = arith.constant dense<0.000000e+00> : vector<8x128xf32>
    %5 = tpu.matmul %3, %4, %cst {dimension_numbers = #tpu.dot_dimension_numbers<[1], [0], [0], [1], [0, 0, 1, 1], [], []>} : vector<8x32xbf16>, vector<32x128xbf16>, vector<8x128xf32> -> vector<8x128xf32>
    %c0_4 = arith.constant 0 : index
    %c0_5 = arith.constant 0 : index
    %6 = vector.load %arg13[%c0_4, %c0_5] : memref<1x128xf32, #tpu.memory_space<vmem>>, vector<1x128xf32>
    %7 = vector.broadcast %6 : vector<1x128xf32> to vector<8x128xf32>
    %8 = arith.addf %5, %7 : vector<8x128xf32>
    %cst_6 = arith.constant 5.000000e-01 : f32
    %9 = vector.broadcast %cst_6 : f32 to vector<8x128xf32>
    %10 = arith.mulf %9, %8 : vector<8x128xf32>
    %cst_7 = arith.constant 4.471500e-02 : f32
    %11 = vector.broadcast %cst_7 : f32 to vector<8x128xf32>
    %12 = arith.mulf %11, %8 : vector<8x128xf32>
    %13 = arith.mulf %12, %8 : vector<8x128xf32>
    %14 = arith.mulf %13, %8 : vector<8x128xf32>
    %15 = arith.addf %8, %14 : vector<8x128xf32>
    %cst_8 = arith.constant 0.797884583 : f32
    %16 = vector.broadcast %cst_8 : f32 to vector<8x128xf32>
    %17 = arith.mulf %16, %15 : vector<8x128xf32>
    %18 = math.tanh %17 : vector<8x128xf32>
    %cst_9 = arith.constant 1.000000e+00 : f32
    %19 = vector.broadcast %cst_9 : f32 to vector<8x128xf32>
    %20 = arith.addf %19, %18 : vector<8x128xf32>
    %21 = arith.mulf %10, %20 : vector<8x128xf32>
    %c0_10 = arith.constant 0 : index
    %c0_11 = arith.constant 0 : index
    %22 = vector.load %arg19[%c0_10, %c0_11] : memref<8x32xf32, #tpu.memory_space<vmem>>, vector<8x32xf32>
    %23 = arith.truncf %21 : vector<8x128xf32> to vector<8x128xbf16>
    %c0_12 = arith.constant 0 : index
    %c0_13 = arith.constant 0 : index
    %24 = vector.load %arg14[%c0_12, %c0_13] : memref<128x32xbf16, #tpu.memory_space<vmem>>, vector<128x32xbf16>
    %cst_14 = arith.constant dense<0.000000e+00> : vector<8x32xf32>
    %25 = tpu.matmul %23, %24, %cst_14 {dimension_numbers = #tpu.dot_dimension_numbers<[1], [0], [0], [1], [0, 0, 1, 1], [], []>} : vector<8x128xbf16>, vector<128x32xbf16>, vector<8x32xf32> -> vector<8x32xf32>
    %26 = arith.addf %22, %25 : vector<8x32xf32>
    %c0_15 = arith.constant 0 : index
    %c0_16 = arith.constant 0 : index
    %27 = vector.load %arg19[%c0_15, %c0_16] : memref<8x32xf32, #tpu.memory_space<vmem>>, vector<8x32xf32>
    tpu.vector_store %arg19[%c0_15, %c0_16], %26 {strides = array<i32>} : memref<8x32xf32, #tpu.memory_space<vmem>>, vector<8x32xf32>,
    %c0_i32_17 = arith.constant 0 : i32
    %28 = arith.cmpi eq, %arg2, %c0_i32_17 : i32
    %29 = arith.extui %28 : i1 to i32
    %c0_i32_18 = arith.constant 0 : i32
    %30 = arith.cmpi ne, %29, %c0_i32_18 : i32
    scf.if %30 {
      %c0_19 = arith.constant 0 : index
      %c0_20 = arith.constant 0 : index
      %31 = vector.load %arg17[%c0_19, %c0_20] : memref<8x32xf32, #tpu.memory_space<vmem>>, vector<8x32xf32>
      %c0_21 = arith.constant 0 : index
      %c0_22 = arith.constant 0 : index
      %32 = vector.load %arg19[%c0_21, %c0_22] : memref<8x32xf32, #tpu.memory_space<vmem>>, vector<8x32xf32>
      %33 = arith.addf %31, %32 : vector<8x32xf32>
      %c0_23 = arith.constant 0 : index
      %c0_24 = arith.constant 0 : index
      %34 = vector.load %arg15[%c0_23, %c0_24] : memref<1x32xf32, #tpu.memory_space<vmem>>, vector<1x32xf32>
      %35 = vector.broadcast %34 : vector<1x32xf32> to vector<8x32xf32>
      %36 = arith.addf %33, %35 : vector<8x32xf32>
      %c0_25 = arith.constant 0 : index
      %c0_26 = arith.constant 0 : index
      %c0_27 = arith.constant 0 : index
      %37 = vector.load %arg16[%c0_25, %c0_26, %c0_27] : memref<1x8x32xf32, #tpu.memory_space<vmem>>, vector<1x8x32xf32>
      %38 = vector.shape_cast %37 : vector<1x8x32xf32> to vector<8x32xf32>
      %39 = vector.shape_cast %36 : vector<8x32xf32> to vector<1x8x32xf32>
      tpu.vector_store %arg16[%c0_25, %c0_26, %c0_27], %39 {strides = array<i32>} : memref<1x8x32xf32, #tpu.memory_space<vmem>>, vector<1x8x32xf32>,
    } else {
    }
    return
  }
  func.func @transform_0(%arg0: i32, %arg1: i32, %arg2: i32) -> (i32, i32, i32) {
    %c0_i32 = arith.constant 0 : i32
    %c0_i32_0 = arith.constant 0 : i32
    return %arg0, %arg1, %c0_i32 : i32, i32, i32
  }
  func.func @transform_1(%arg0: i32, %arg1: i32, %arg2: i32) -> (i32, i32, i32, i32) {
    %c0_i32 = arith.constant 0 : i32
    %c0_i32_0 = arith.constant 0 : i32
    %c0_i32_1 = arith.constant 0 : i32
    return %arg0, %c0_i32, %arg1, %c0_i32_0 : i32, i32, i32, i32
  }
  func.func @transform_2(%arg0: i32, %arg1: i32, %arg2: i32) -> (i32, i32, i32, i32) {
    %c0_i32 = arith.constant 0 : i32
    %c0_i32_0 = arith.constant 0 : i32
    %c0_i32_1 = arith.constant 0 : i32
    %c0_i32_2 = arith.constant 0 : i32
    return %arg0, %c0_i32, %c0_i32_0, %c0_i32_1 : i32, i32, i32, i32
  }
  func.func @transform_3(%arg0: i32, %arg1: i32, %arg2: i32) -> (i32, i32, i32, i32) {
    %c0_i32 = arith.constant 0 : i32
    %c0_i32_0 = arith.constant 0 : i32
    %c0_i32_1 = arith.constant 0 : i32
    %c0_i32_2 = arith.constant 0 : i32
    return %arg0, %c0_i32, %c0_i32_0, %c0_i32_1 : i32, i32, i32, i32
  }
  func.func @transform_4(%arg0: i32, %arg1: i32, %arg2: i32) -> (i32, i32, i32) {
    %c0_i32 = arith.constant 0 : i32
    %c0_i32_0 = arith.constant 0 : i32
    %c0_i32_1 = arith.constant 0 : i32
    return %arg0, %c0_i32, %c0_i32_0 : i32, i32, i32
  }
  func.func @transform_5(%arg0: i32, %arg1: i32, %arg2: i32) -> (i32, i32, i32) {
    %c0_i32 = arith.constant 0 : i32
    %c0_i32_0 = arith.constant 0 : i32
    %c0_i32_1 = arith.constant 0 : i32
    %c0_i32_2 = arith.constant 0 : i32
    return %c0_i32, %c0_i32_0, %c0_i32_1 : i32, i32, i32
  }
  func.func @transform_6(%arg0: i32, %arg1: i32, %arg2: i32) -> (i32, i32) {
    %c0_i32 = arith.constant 0 : i32
    %c0_i32_0 = arith.constant 0 : i32
    %c0_i32_1 = arith.constant 0 : i32
    return %c0_i32, %c0_i32_0 : i32, i32
  }
  func.func @transform_7(%arg0: i32, %arg1: i32, %arg2: i32) -> (i32, i32) {
    %c0_i32 = arith.constant 0 : i32
    %c0_i32_0 = arith.constant 0 : i32
    %c0_i32_1 = arith.constant 0 : i32
    return %c0_i32, %c0_i32_0 : i32, i32
  }
  func.func @transform_8(%arg0: i32, %arg1: i32, %arg2: i32) -> (i32, i32) {
    %c0_i32 = arith.constant 0 : i32
    %c0_i32_0 = arith.constant 0 : i32
    %c0_i32_1 = arith.constant 0 : i32
    return %c0_i32, %c0_i32_0 : i32, i32
  }
  func.func @transform_9(%arg0: i32, %arg1: i32, %arg2: i32) -> (i32, i32) {
    %c0_i32 = arith.constant 0 : i32
    %c0_i32_0 = arith.constant 0 : i32
    return %c0_i32, %arg2 : i32, i32
  }
  func.func @transform_10(%arg0: i32, %arg1: i32, %arg2: i32) -> (i32, i32) {
    %c0_i32 = arith.constant 0 : i32
    %c0_i32_0 = arith.constant 0 : i32
    return %c0_i32, %arg2 : i32, i32
  }
  func.func @transform_11(%arg0: i32, %arg1: i32, %arg2: i32) -> (i32, i32) {
    %c0_i32 = arith.constant 0 : i32
    %c0_i32_0 = arith.constant 0 : i32
    return %arg2, %c0_i32 : i32, i32
  }
  func.func @transform_12(%arg0: i32, %arg1: i32, %arg2: i32) -> (i32, i32) {
    %c0_i32 = arith.constant 0 : i32
    %c0_i32_0 = arith.constant 0 : i32
    %c0_i32_1 = arith.constant 0 : i32
    return %c0_i32, %c0_i32_0 : i32, i32
  }
  func.func @transform_13(%arg0: i32, %arg1: i32, %arg2: i32) -> (i32, i32, i32) {
    %c0_i32 = arith.constant 0 : i32
    %c0_i32_0 = arith.constant 0 : i32
    return %arg0, %arg1, %c0_i32 : i32, i32, i32
  }
}

module attributes {stable_mosaic.version = 11 : i64} {
  func.func @_lm_head_kernel(%arg0: i32, %arg1: i32, %arg2: i32, %arg3: memref<1x8x32xf32, #tpu.memory_space<vmem>>, %arg4: memref<32x128xbf16, #tpu.memory_space<vmem>>, %arg5: memref<1x128xf32, #tpu.memory_space<vmem>>, %arg6: memref<1x8x128xbf16, #tpu.memory_space<vmem>>) attributes {dimension_semantics = [#tpu.dimension_semantics<parallel>, #tpu.dimension_semantics<parallel>, #tpu.dimension_semantics<parallel>], iteration_bounds = array<i64: 1, 2, 1>, scalar_prefetch = 0 : i64, scratch_operands = 0 : i64, tpu.core_type = #tpu.core_type<tc>, window_params = [{transform_indices = @transform_0, window_bounds = array<i64: 1, 8, 32>}, {transform_indices = @transform_1, window_bounds = array<i64: 32, 128>}, {transform_indices = @transform_2, window_bounds = array<i64: 1, 128>}, {transform_indices = @transform_3, window_bounds = array<i64: 1, 8, 128>}]} {
    %c0 = arith.constant 0 : index
    %c0_0 = arith.constant 0 : index
    %c0_1 = arith.constant 0 : index
    %0 = vector.load %arg3[%c0, %c0_0, %c0_1] : memref<1x8x32xf32, #tpu.memory_space<vmem>>, vector<1x8x32xf32>
    %1 = vector.shape_cast %0 : vector<1x8x32xf32> to vector<8x32xf32>
    %2 = arith.truncf %1 : vector<8x32xf32> to vector<8x32xbf16>
    %c0_2 = arith.constant 0 : index
    %c0_3 = arith.constant 0 : index
    %3 = vector.load %arg4[%c0_2, %c0_3] : memref<32x128xbf16, #tpu.memory_space<vmem>>, vector<32x128xbf16>
    %cst = arith.constant dense<0.000000e+00> : vector<8x128xf32>
    %4 = tpu.matmul %2, %3, %cst {dimension_numbers = #tpu.dot_dimension_numbers<[1], [0], [0], [1], [0, 0, 1, 1], [], []>} : vector<8x32xbf16>, vector<32x128xbf16>, vector<8x128xf32> -> vector<8x128xf32>
    %c0_4 = arith.constant 0 : index
    %c0_5 = arith.constant 0 : index
    %5 = vector.load %arg5[%c0_4, %c0_5] : memref<1x128xf32, #tpu.memory_space<vmem>>, vector<1x128xf32>
    %6 = vector.broadcast %5 : vector<1x128xf32> to vector<8x128xf32>
    %7 = arith.addf %4, %6 : vector<8x128xf32>
    %8 = arith.truncf %7 : vector<8x128xf32> to vector<8x128xbf16>
    %c0_6 = arith.constant 0 : index
    %c0_7 = arith.constant 0 : index
    %c0_8 = arith.constant 0 : index
    %9 = vector.load %arg6[%c0_6, %c0_7, %c0_8] : memref<1x8x128xbf16, #tpu.memory_space<vmem>>, vector<1x8x128xbf16>
    %10 = vector.shape_cast %9 : vector<1x8x128xbf16> to vector<8x128xbf16>
    %11 = vector.shape_cast %8 : vector<8x128xbf16> to vector<1x8x128xbf16>
    tpu.vector_store %arg6[%c0_6, %c0_7, %c0_8], %11 {strides = array<i32>} : memref<1x8x128xbf16, #tpu.memory_space<vmem>>, vector<1x8x128xbf16>,
    return
  }
  func.func @transform_0(%arg0: i32, %arg1: i32, %arg2: i32) -> (i32, i32, i32) {
    %c0_i32 = arith.constant 0 : i32
    %c0_i32_0 = arith.constant 0 : i32
    return %arg1, %arg2, %c0_i32 : i32, i32, i32
  }
  func.func @transform_1(%arg0: i32, %arg1: i32, %arg2: i32) -> (i32, i32) {
    %c0_i32 = arith.constant 0 : i32
    %c0_i32_0 = arith.constant 0 : i32
    return %c0_i32, %arg0 : i32, i32
  }
  func.func @transform_2(%arg0: i32, %arg1: i32, %arg2: i32) -> (i32, i32) {
    %c0_i32 = arith.constant 0 : i32
    %c0_i32_0 = arith.constant 0 : i32
    return %c0_i32, %arg0 : i32, i32
  }
  func.func @transform_3(%arg0: i32, %arg1: i32, %arg2: i32) -> (i32, i32, i32) {
    %c0_i32 = arith.constant 0 : i32
    return %arg1, %arg2, %arg0 : i32, i32, i32
  }
}

</mosaic_0001>

<bundles_post_ra>
// kernel: my_chinese_bert_forward.9
= control target key start
LH: loop header
LB: loop body
LE: loop exit
PB: predicated region body
PF: predicated region fallthrough
CT: control target
= control target key end

     0   :  { %s491_s12 = smov 0   ;;  %s493_s13 = smov 0   ;;  %s530_s0 = inlined_call_operand.vmem [shape: f32[2,8,32], index: 0, kind: input, shape index: {}]   ;;  %s531_s1 = inlined_call_operand.vmem [shape: bf16[32,128], index: 1, kind: input, shape index: {}]   ;;  %s532_s2 = inlined_call_operand.vmem [shape: f32[1,128], index: 2, kind: input, shape index: {}]   ;;  %s533_s3 = inlined_call_operand.vmem [shape: bf16[2,8,128], index: 3, kind: output, shape index: {}]  }
   0x1   :  { %s495_s14 = smov 0  }
   0x2 LB: > { %s28_s15 = sadd.s32 1, %s465_s13  ;;  %p406_p0 = scmp.ge.s32.totalorder %s469_s14, 1  ;;  %s469_s14 = sphi %s495_s14, %s13_s14   ;;  %s465_s13 = sphi %s493_s13, %s535_s13   ;;  %s461_s12 = sphi %s491_s12, %s534_s12  }
   0x3   : > { %p30_p1 = scmp.ge.s32.totalorder %s28_s15, 2  ;;  %p181_p2 = scmp.lt.s32.totalorder %s469_s14, 3 }
   0x5   : > { %s537_s15 = smov (%p30_p1, %s28_s15), 0  ;;  %p182_p3 = pnand %p406_p0, %p181_p2 }
   0x6   : > { %p219_p4 = scmp.lt.s32.totalorder (!%p182_p3), %s461_s12, 1 }
   0x7   : > { %185 = sbr.rel (%p182_p3) target bundleno = 154 (0x9a), region = 32 }
   0xc   : > { %v421_v0 = vld [vmem:[%s531_s1 + $0x8] sm:$0xff]  ;;  %v420_v1 = vld [vmem:[%s531_s1] sm:$0xff]  ;;  %s539_s12 = smov (!%p219_p4, %s461_s12), 1  ;;  %vm266_vm0 = vcmask 261120  }
   0xd   : > { %276 = vmatpush.bf16.msra.mxu0 %v421_v0  ;;  %s407_s20 = sshll.u32 %s539_s12, 3  ;;  %v446_v4 = vld [vmem:[%s532_s2] ss:$0 sm:$0xff]  ;;  %s408_s26 = sshll.u32 %s539_s12, 2 }
   0xe   : > { %s225_s23 = scalar_lea.vmem %s530_s0, %s407_s20  ;;  %s242_s29 = scalar_lea.vmem %s533_s3, %s408_s26 }
   0xf   : > { %v244_v2 = vld [vmem:[%s225_s23] sm:$0xff] }
  0x10   : > { %v245_v3 = vpack.c.bf16 %v244_v2, %v244_v2 }
  0x11   : > { %277 = vmatpush.bf16.msra.mxu0 %v420_v1 }
  0x14   : > { %417 = vmatmul.msk.bf16.vlgmr.msra.gmra.mxu0 %vm266_vm0, %v245_v3 }
  0x91   : > { %v279_v5 = vpop.f32.mrf.mxu0 }
  0x92   : > { %v280_v6 = vadd.f32 %v446_v4, %v279_v5 }
  0x94   : > { %v283_v7 = vpack.c.bf16 %v280_v6, %v280_v6 }
  0x96   : > { %284 = vst [vmem:[%s242_s29] sm:$0xf] %v283_v7 }
  0x99   : > { %v281_v8 = vpop.f32.mrf.mxu0 }
  0x9a PF: > { %s13_s14 = sadd.s32 1, %s469_s14   ;;  %s534_s12 = smov %s465_s13 }
  0x9b   : > { %p10_p5 = scmp.ge.s32.totalorder %s13_s14, 4   ;;  %s535_s13 = smov %s537_s15 }
  0x9d   :  { %12 = sbr.rel (!%p10_p5) target bundleno = 2 (0x2), region = 68 }

// kernel: my_chinese_bert_forward.5
= control target key start
LH: loop header
LB: loop body
LE: loop exit
PB: predicated region body
PF: predicated region fallthrough
CT: control target
= control target key end

     0   :  { %s717_s24 = smov 0   ;;  %s719_s25 = smov 0   ;;  %s778_s0 = inlined_call_operand.vmem [shape: f32[2,8,32], index: 0, kind: input, shape index: {}]   ;;  %s779_s1 = inlined_call_operand.vmem [shape: f32[1,32], index: 1, kind: input, shape index: {}]   ;;  %s780_s2 = inlined_call_operand.vmem [shape: f32[1,32], index: 2, kind: input, shape index: {}]   ;;  %s781_s3 = inlined_call_operand.vmem [shape: bf16[32,96], index: 3, kind: input, shape index: {}]   ;;  %s782_s4 = inlined_call_operand.vmem [shape: f32[1,96], index: 4, kind: input, shape index: {}]   ;;  %s783_s5 = inlined_call_operand.vmem [shape: bf16[2,8,32], index: 5, kind: output, shape index: {0}]   ;;  %s784_s6 = inlined_call_operand.vmem [shape: bf16[2,8,32], index: 6, kind: output, shape index: {1}]   ;;  %s785_s7 = inlined_call_operand.vmem [shape: bf16[2,8,32], index: 7, kind: output, shape index: {2}]  }
   0x1   :  { %s721_s26 = smov 0  }
   0x2 LB: > { %s30_s27 = sadd.s32 1, %s668_s25  ;;  %p596_p0 = scmp.ge.s32.totalorder %s672_s26, 1  ;;  %s672_s26 = sphi %s721_s26, %s18_s26   ;;  %s668_s25 = sphi %s719_s25, %s787_s25   ;;  %s664_s24 = sphi %s717_s24, %s786_s24  }
   0x3   : > { %p32_p1 = scmp.ge.s32.totalorder %s30_s27, 2  ;;  %p264_p2 = scmp.lt.s32.totalorder %s672_s26, 3 }
   0x5   : > { %s789_s27 = smov (%p32_p1, %s30_s27), 0  ;;  %p265_p3 = pnand %p596_p0, %p264_p2 }
   0x6   : > { %p314_p4 = scmp.lt.s32.totalorder (!%p265_p3), %s664_s24, 1  ;;  %s675_s23 = smov (!%p265_p3), 96  }
   0x7   : > { %268 = sbr.rel (%p265_p3) target bundleno = 548 (0x224), region = 40 }
   0xc   : > { %s791_s24 = smov (!%p314_p4, %s664_s24), 1  ;;  %vm346_vm0 = vcmask 261120   ;;  %v674_v2 = vmov 32.0   ;;  %v613_v14 = vld [vmem:[%s781_s3 + $0x8] sm:$0xff]  ;;  %v612_v15 = vld [vmem:[%s781_s3] sm:$0xff]  ;;  %vm425_vm4 = vcmask 257024  }
   0xd   : > { %s597_s28 = sshll.u32 %s791_s24, 3  ;;  %644 = vrcp.f32 %v674_v2  ;;  %417 = vmatpush.bf16.msra.mxu0 %v613_v14  ;;  %v641_v29 = vld [vmem:[%s779_s1] ss:$0 sm:$0xff]  ;;  %s598_s19 = sshll.u32 %s791_s24, 2 }
   0xe   : > { %s320_s8 = scalar_lea.vmem %s778_s0, %s597_s28  ;;  %v642_v31 = vld [vmem:[%s780_s2] ss:$0 sm:$0xff]  ;;  %s327_s22 = scalar_lea.vmem %s783_s5, %s598_s19 }
   0xf   : > { %v343_v0 = vld [vmem:[%s320_s8] sm:$0xff]  ;;  %s676_s28 = smov 64   ;;  %s334_s8 = scalar_lea.vmem %s784_s6, %s598_s19 }
  0x10   : > { %v347_v1 = vsel %vm346_vm0, %v343_v0, 0.0  ;;  %v643_v36 = vld [vmem:[%s782_s4] ss:$0 sm:$0xff]  ;;  %s341_s10 = scalar_lea.vmem %s785_s7, %s598_s19 }
  0x11   : > { %348 = vadd.xlane.f32.xlu0 %v347_v1  ;;  %418 = vmatpush.bf16.msra.mxu0 %v612_v15 }
  0x13   : > { %v645_v3 = vpop.eup %644 }
  0x14   : > { %v351_v4 = vmul.f32 32.0, %v645_v3  ;;  %vm355_vm1 = vweird.f32 %v645_v3 }
  0x16   : > { %v352_v5 = vsub.f32 1.0, %v351_v4 }
  0x18   : > { %v353_v6 = vmul.f32 %v645_v3, %v352_v5 }
  0x1a   : > { %v354_v7 = vadd.f32 %v645_v3, %v353_v6 }
  0x1c   : > { %v356_v8 = vsel %vm355_vm1, %v645_v3, %v354_v7 }
  0x84   : > { %v349_v9 = vpop.xlane.xlu0 %348 }
  0x85   : > { %v357_v10 = vmul.f32 %v356_v8, %v349_v9 }
  0x87   : > { %v358_v11 = vsub.f32 %v343_v0, %v357_v10 }
  0x89   : > { %v359_v12 = vmul.f32 %v358_v11, %v358_v11  ;;  %v381_v30 = vmul.f32 %v641_v29, %v358_v11 }
  0x8b   : > { %v360_v13 = vsel %vm346_vm0, %v359_v12, 0.0 }
  0x8c   : > { %361 = vadd.xlane.f32.xlu0 %v360_v13 }
  0xff   : > { %v362_v16 = vpop.xlane.xlu0 %361 }
 0x100   : > { %v363_v17 = vmul.f32 0.032258064, %v362_v16 }
 0x102   : > { %646 = vrsqrt.f32 %v363_v17  ;;  %vm371_vm2 = vcmp.eq.f32.partialorder %v363_v17, inf  ;;  %v374_v25 = vand.u32 2147483648, %v363_v17  ;;  %vm373_vm3 = vcmp.eq.f32.partialorder %v363_v17, 0.0 }
 0x108   : > { %v647_v18 = vpop.eup %646 }
 0x109   : > { %v365_v19 = vmul.f32 %v647_v18, %v363_v17 }
 0x10b   : > { %v366_v20 = vmul.f32 %v647_v18, %v365_v19 }
 0x10d   : > { %v367_v21 = vmul.f32 0.5, %v366_v20 }
 0x10f   : > { %v368_v22 = vsub.f32 1.5, %v367_v21 }
 0x111   : > { %v369_v23 = vmul.f32 %v647_v18, %v368_v22 }
 0x113   : > { %v370_v24 = vmul.f32 %v369_v23, %v363_v17 }
 0x115   : > { %v372_v26 = vsel %vm371_vm2, %v363_v17, %v370_v24 }
 0x116   : > { %v375_v27 = vsel %vm373_vm3, %v374_v25, %v372_v26 }
 0x117   : > { %v376_v28 = vadd.f32 1e-06, %v375_v27 }
 0x119   : > { %648 = vrcp.f32 %v376_v28 }
 0x11f   : > { %v649_v32 = vpop.eup %648 }
 0x120   : > { %v382_v33 = vmul.f32 %v649_v32, %v381_v30 }
 0x122   : > { %v386_v34 = vadd.f32 %v642_v31, %v382_v33 }
 0x124   : > { %v387_v35 = vpack.c.bf16 %v386_v34, %v386_v34 }
 0x126   : > { %609 = vmatmul.msk.bf16.vlgmr.msra.gmra.mxu0 %vm346_vm0, %v387_v35 }
 0x1a3   : > { %v420_v37 = vpop.f32.mrf.mxu0 }
 0x1a4   : > { %v421_v38 = vadd.f32 %v643_v36, %v420_v37 }
 0x1a6   : > { %v424_v39 = vpack.c.bf16 %v421_v38, %v421_v38 }
 0x1a8   : > { %428 = vrot.lane.b32.xlu1 %v424_v39, %s675_s23  ;;  %426 = vst.msk [vmem:[%s327_s22] sm:$0xf] %vm425_vm4, %v424_v39 }
 0x1ab   : > { %v422_v40 = vpop.f32.mrf.mxu0 }
 0x1b0   : > { %432 = vrot.lane.b32.xlu1 %v424_v39, %s676_s28 }
 0x21a   : > { %v429_v41 = vpop.permute.xlu1 %428 }
 0x21b   : > { %431 = vst.msk [vmem:[%s334_s8] sm:$0xf] %vm425_vm4, %v429_v41 }
 0x222   : > { %v433_v42 = vpop.permute.xlu1 %432 }
 0x223   : > { %435 = vst.msk [vmem:[%s341_s10] sm:$0xf] %vm425_vm4, %v433_v42 }
 0x224 PF: > { %s18_s26 = sadd.s32 1, %s672_s26   ;;  %s786_s24 = smov %s668_s25 }
 0x225   : > { %p15_p5 = scmp.ge.s32.totalorder %s18_s26, 4   ;;  %s787_s25 = smov %s789_s27 }
 0x227   :  { %17 = sbr.rel (!%p15_p5) target bundleno = 2 (0x2), region = 94 }

// kernel: my_chinese_bert_forward.6
= control target key start
LH: loop header
LB: loop body
LE: loop exit
PB: predicated region body
PF: predicated region fallthrough
CT: control target
= control target key end

     0   :  { %s1530_s25 = smov 0   ;;  %s1532_s26 = smov 0   ;;  %s1685_s0 = inlined_call_operand.vmem [shape: f32[2,8,32], index: 0, kind: input, shape index: {}]   ;;  %s1686_s1 = inlined_call_operand.vmem [shape: bf16[2,4,8,8], index: 1, kind: input, shape index: {}]   ;;  %s1687_s2 = inlined_call_operand.vmem [shape: bf16[2,4,8,8], index: 2, kind: input, shape index: {}]   ;;  %s1688_s3 = inlined_call_operand.vmem [shape: bf16[2,4,8,8], index: 3, kind: input, shape index: {}]   ;;  %s1689_s4 = inlined_call_operand.vmem [shape: f32[2,1,8], index: 4, kind: input, shape index: {}]   ;;  %s1690_s5 = inlined_call_operand.vmem [shape: bf16[4,8,32], index: 5, kind: input, shape index: {}]   ;;  %s1691_s6 = inlined_call_operand.vmem [shape: f32[1,32], index: 6, kind: input, shape index: {}]   ;;  %s1692_s7 = inlined_call_operand.vmem [shape: f32[1,32], index: 7, kind: input, shape index: {}]   ;;  %s1693_s8 = inlined_call_operand.vmem [shape: f32[1,32], index: 8, kind: input, shape index: {}]   ;;  %s1694_s9 = inlined_call_operand.vmem [shape: bf16[32,128], index: 9, kind: input, shape index: {}]   ;;  %s1695_s10 = inlined_call_operand.vmem [shape: f32[1,128], index: 10, kind: input, shape index: {}]   ;;  %s1696_s11 = inlined_call_operand.vmem [shape: bf16[128,32], index: 11, kind: input, shape index: {}]   ;;  %s1697_s12 = inlined_call_operand.vmem [shape: f32[1,32], index: 12, kind: input, shape index: {}]   ;;  %s1698_s13 = inlined_call_operand.vmem [shape: f32[2,8,32], index: 13, kind: output, shape index: {}]  }
   0x1   :  { %s1534_s27 = smov 0  }
   0x2 LB: > { %s42_s28 = sadd.s32 1, %s1452_s26  ;;  %p1298_p0 = scmp.ge.s32.totalorder %s1456_s27, 1  ;;  %s1456_s27 = sphi %s1534_s27, %s23_s27   ;;  %s1452_s26 = sphi %s1532_s26, %s1700_s26   ;;  %s1448_s25 = sphi %s1530_s25, %s1699_s25  }
   0x3   : > { %p44_p1 = scmp.ge.s32.totalorder %s42_s28, 2  ;;  %p483_p2 = scmp.lt.s32.totalorder %s1456_s27, 3 }
   0x5   : > { %s1702_s28 = smov (%p44_p1, %s42_s28), 0  ;;  %p484_p3 = pnand %p1298_p0, %p483_p2 }
   0x6   : > { %p564_p4 = scmp.lt.s32.totalorder (!%p484_p3), %s1448_s25, 1 }
   0x7   : > { %487 = sbr.rel (%p484_p3) target bundleno = 1162 (0x48a), region = 72 }
   0xc   : > { %s1704_s25 = smov (!%p564_p4, %s1448_s25), 1  ;;  %vm634_vm0 = vcmask 64512   ;;  %vm754_vm1 = vcmask 1043456   ;;  %v1316_v61 = vld [vmem:[%s1690_s5 + $0x4] sm:$0xf]  ;;  %vm932_vm2 = vcmask 261120  }
   0xd   : > { %s1551_s29 = sshll.u32 %s1704_s25, 4  ;;  %s591_s15 = scalar_lea.vmem %s1689_s4, %s1704_s25  ;;  %v871_v62 = vsel %vm754_vm1, %v1316_v61, 0  ;;  %v841_v63 = vld [vmem:[%s1690_s5] sm:$0xf]  ;;  %vm977_vm6 = vcmask 257024  }
   0xe   : > { %s583_s18 = scalar_lea.vmem %s1687_s2, %s1551_s29  ;;  %s578_s21 = scalar_lea.vmem %s1686_s1, %s1551_s29  ;;  %v1404_v12 = vld [vmem:[%s591_s15] ss:$0 sm:$0xff] }
   0xf   : > { %v622_v0 = vld [vmem:[%s583_s18] sm:$0xf]  ;;  %v623_v1 = vld [vmem:[%s583_s18 + $0x4] sm:$0xf]  ;;  %v624_v4 = vld [vmem:[%s583_s18 + $0x8] sm:$0xf]  ;;  %s588_s24 = scalar_lea.vmem %s1688_s3, %s1551_s29 }
  0x10   : > { %v639_v2 = vsel %vm634_vm0, %v622_v0, 0  ;;  %v658_v3 = vsel %vm634_vm0, %v623_v1, 0  ;;  %v677_v5 = vsel %vm634_vm0, %v624_v4, 0  ;;  %v625_v6 = vld [vmem:[%s583_s18 + $0xc] sm:$0xf]  ;;  %v846_v0 = vsel %vm754_vm1, %v841_v63, 0 }
  0x11   : > { %648 = vmatpush.bf16.xpose.msra.mxu0 %v639_v2  ;;  %667 = vmatpush.bf16.xpose.msra.mxu2 %v658_v3  ;;  %v696_v7 = vsel %vm634_vm0, %v625_v6, 0  ;;  %v618_v8 = vld [vmem:[%s578_s21] sm:$0xf]  ;;  %v619_v9 = vld [vmem:[%s578_s21 + $0x4] sm:$0xf]  ;;  %s1299_s22 = sshll.u32 %s1704_s25, 3 }
  0x12   : > { %705 = vmatpush.bf16.xpose.msra.mxu3 %v696_v7  ;;  %v621_v10 = vld [vmem:[%s578_s21 + $0xc] sm:$0xf]  ;;  %v620_v11 = vld [vmem:[%s578_s21 + $0x8] sm:$0xf]  ;;  %v626_v29 = vld [vmem:[%s588_s24] sm:$0xf]  ;;  %s570_s29 = scalar_lea.vmem %s1685_s0, %s1299_s22  ;;  %s611_s19 = scalar_lea.vmem %s1698_s13, %s1299_s22 }
  0x13   : > { %v756_v30 = vsel %vm754_vm1, %v626_v29, 0  ;;  %v627_v31 = vld [vmem:[%s588_s24 + $0x4] sm:$0xf]  ;;  %v628_v33 = vld [vmem:[%s588_s24 + $0x8] sm:$0xf] }
  0x14   : > { %v775_v32 = vsel %vm754_vm1, %v627_v31, 0  ;;  %v794_v35 = vsel %vm754_vm1, %v628_v33, 0  ;;  %v629_v37 = vld [vmem:[%s588_s24 + $0xc] sm:$0xf]  ;;  %v1318_v1 = vld [vmem:[%s1690_s5 + $0x8] sm:$0xf] }
  0x15   : > { %784 = vmatpush.bf16.msra.mxu1 %v775_v32  ;;  %v813_v39 = vsel %vm754_vm1, %v629_v37, 0  ;;  %v893_v2 = vsel %vm754_vm1, %v1318_v1, 0  ;;  %v1320_v3 = vld [vmem:[%s1690_s5 + $0xc] sm:$0xf]  ;;  %v1405_v32 = vld [vmem:[%s1691_s6] ss:$0 sm:$0xff] }
  0x16   : > { %v1377_v1 = vld [vmem:[%s1696_s11 + $0x38] sm:$0xff] }
  0x18   : > { %1307 = vmatmul.msk.bf16.vlgmr.msra.gmra.mxu0 %vm634_vm0, %v618_v8  ;;  %1308 = vmatmul.msk.bf16.vlgmr.msra.gmra.mxu2 %vm634_vm0, %v619_v9 }
  0x19   : > { %686 = vmatpush.bf16.xpose.msrb.mxu2 %v677_v5  ;;  %1310 = vmatmul.msk.bf16.vlgmr.msra.gmra.mxu3 %vm634_vm0, %v621_v10  ;;  %v915_v5 = vsel %vm754_vm1, %v1320_v3, 0  ;;  %v1376_v3 = vld [vmem:[%s1696_s11 + $0x30] sm:$0xff] }
  0x1a   : > { %765 = vmatpush.bf16.msrb.mxu0 %v756_v30  ;;  %822 = vmatpush.bf16.msrb.mxu3 %v813_v39  ;;  %v617_v39 = vld [vmem:[%s570_s29] sm:$0xff] }
  0x1b   : > { %880 = vmatpush.bf16.msrb.mxu1 %v871_v62 }
  0x1e   : > { %855 = vmatpush.bf16.msra.mxu0 %v846_v0  ;;  %924 = vmatpush.bf16.msra.mxu3 %v915_v5 }
  0x21   : > { %803 = vmatpush.bf16.msra.mxu2 %v794_v35 }
  0x28   : > { %1309 = vmatmul.msk.bf16.vlgmr.msrb.gmra.mxu2 %vm634_vm0, %v620_v11 }
  0x29   : > { %902 = vmatpush.bf16.msrb.mxu2 %v893_v2 }
  0x95   : > { %v650_v13 = vpop.f32.mrf.mxu0 }
  0x96   : > { %v651_v14 = vadd.f32 %v1404_v12, %v650_v13 }
  0x98   : > { %v711_v15 = vsel %vm634_vm0, %v651_v14, -inf }
  0x99   : > { %712 = vmax.xlane.f32.xlu1 %v711_v15 }
  0x9b   : > { %v669_v16 = vpop.f32.mrf.mxu2 }
  0x9c   : > { %v670_v17 = vadd.f32 %v1404_v12, %v669_v16  ;;  %v707_v18 = vpop.f32.mrf.mxu3 }
  0x9d   : > { %v652_v19 = vpop.f32.mrf.mxu0  ;;  %v708_v26 = vadd.f32 %v1404_v12, %v707_v18 }
  0x9e   : > { %v714_v20 = vsel %vm634_vm0, %v670_v17, -inf }
  0x9f   : > { %v720_v28 = vsel %vm634_vm0, %v708_v26, -inf }
  0xa1   : > { %715 = vmax.xlane.f32.xlu1 %v714_v20 }
  0xa3   : > { %v671_v21 = vpop.f32.mrf.mxu2 }
  0xa4   : > { %v709_v22 = vpop.f32.mrf.mxu3 }
  0xab   : > { %v688_v23 = vpop.f32.mrf.mxu2 }
  0xac   : > { %v689_v24 = vadd.f32 %v1404_v12, %v688_v23 }
  0xae   : > { %v717_v25 = vsel %vm634_vm0, %v689_v24, -inf }
  0xaf   : > { %718 = vmax.xlane.f32.xlu0 %v717_v25 }
  0xb3   : > { %v690_v27 = vpop.f32.mrf.mxu2 }
  0xb7   : > { %721 = vmax.xlane.f32.xlu0 %v720_v28 }
 0x10c   : > { %v713_v34 = vpop.xlane.xlu1 %712 }
 0x10d   : > { %v723_v36 = vsub.f32 %v651_v14, %v713_v34 }
 0x10f   : > { %v727_v38 = vmul.f32 1.442695, %v723_v36 }
 0x111   : > { %1410 = vpow2.f32 %v727_v38 }
 0x114   : > { %v716_v40 = vpop.xlane.xlu1 %715 }
 0x115   : > { %v724_v41 = vsub.f32 %v670_v17, %v716_v40 }
 0x117   : > { %v1411_v42 = vpop.eup %1410  ;;  %v729_v43 = vmul.f32 1.442695, %v724_v41 }
 0x118   : > { %v747_v44 = vpack.c.bf16 %v1411_v42, %v1411_v42  ;;  %v735_v59 = vsel %vm634_vm0, %v1411_v42, 0.0 }
 0x119   : > { %1412 = vpow2.f32 %v729_v43 }
 0x11a   : > { %1311 = vmatmul.msk.bf16.vlgmr.msrb.gmra.mxu0 %vm634_vm0, %v747_v44 }
 0x11f   : > { %v1413_v45 = vpop.eup %1412 }
 0x120   : > { %v738_v46 = vsel %vm634_vm0, %v1413_v45, 0.0  ;;  %v748_v47 = vpack.c.bf16 %v1413_v45, %v1413_v45  ;;  %v1458_v45 = vmov 32.0  }
 0x121   : > { %739 = vadd.xlane.f32.xlu1 %v738_v46 }
 0x122   : > { %v719_v48 = vpop.xlane.xlu0 %718  ;;  %1312 = vmatmul.msk.bf16.vlgmr.msra.gmra.mxu1 %vm634_vm0, %v748_v47 }
 0x123   : > { %v725_v49 = vsub.f32 %v689_v24, %v719_v48  ;;  %1093 = vmatpush.bf16.msra.mxu1 %v1377_v1 }
 0x125   : > { %v731_v50 = vmul.f32 1.442695, %v725_v49 }
 0x127   : > { %1414 = vpow2.f32 %v731_v50  ;;  %1094 = vmatpush.bf16.msra.mxu1 %v1376_v3 }
 0x12a   : > { %v722_v51 = vpop.xlane.xlu0 %721 }
 0x12b   : > { %v726_v52 = vsub.f32 %v708_v26, %v722_v51 }
 0x12d   : > { %v1415_v53 = vpop.eup %1414  ;;  %v733_v54 = vmul.f32 1.442695, %v726_v52 }
 0x12e   : > { %v749_v55 = vpack.c.bf16 %v1415_v53, %v1415_v53  ;;  %v741_v56 = vsel %vm634_vm0, %v1415_v53, 0.0 }
 0x12f   : > { %1416 = vpow2.f32 %v733_v54  ;;  %742 = vadd.xlane.f32.xlu2 %v741_v56 }
 0x130   : > { %1313 = vmatmul.msk.bf16.vlgmr.msra.gmra.mxu2 %vm634_vm0, %v749_v55 }
 0x135   : > { %v1417_v57 = vpop.eup %1416 }
 0x136   : > { %v744_v58 = vsel %vm634_vm0, %v1417_v57, 0.0  ;;  %v750_v60 = vpack.c.bf16 %v1417_v57, %v1417_v57 }
 0x137   : > { %745 = vadd.xlane.f32.xlu0 %v744_v58  ;;  %736 = vadd.xlane.f32.xlu2 %v735_v59  ;;  %v1369_v59 = vld [vmem:[%s1694_s9 + $0x8] sm:$0xff] }
 0x138   : > { %1314 = vmatmul.msk.bf16.vlgmr.msrb.gmra.mxu3 %vm634_vm0, %v750_v60  ;;  %1011 = vmatpush.bf16.msrb.mxu0 %v1369_v59  ;;  %v1368_v60 = vld [vmem:[%s1694_s9] sm:$0xff] }
 0x13c   : > { %1012 = vmatpush.bf16.msrb.mxu0 %v1368_v60 }
 0x194   : > { %v740_v4 = vpop.xlane.xlu1 %739 }
 0x195   : > { %1418 = vrcp.f32 %v740_v4 }
 0x197   : > { %v767_v6 = vpop.f32.mrf.mxu0 }
 0x19b   : > { %v1419_v7 = vpop.eup %1418 }
 0x19f   : > { %v769_v8 = vpop.f32.mrf.mxu0  ;;  %v786_v9 = vpop.f32.mrf.mxu1 }
 0x1a0   : > { %v833_v10 = vmul.f32 %v1419_v7, %v786_v9 }
 0x1a2   : > { %v837_v11 = vpack.c.bf16 %v833_v10, %v833_v10  ;;  %v743_v12 = vpop.xlane.xlu2 %742  ;;  %v1406_v10 = vld [vmem:[%s1692_s7] ss:$0 sm:$0xff] }
 0x1a4   : > { %1317 = vmatmul.msk.bf16.vlgmr.msrb.gmra.mxu1 %vm634_vm0, %v837_v11 }
 0x1a7   : > { %v788_v13 = vpop.f32.mrf.mxu1 }
 0x1aa   : > { %v737_v14 = vpop.xlane.xlu2 %736  ;;  %v746_v16 = vpop.xlane.xlu0 %745 }
 0x1ab   : > { %1420 = vrcp.f32 %v737_v14 }
 0x1ac   : > { %1422 = vrcp.f32 %v743_v12  ;;  %v1407_v12 = vld [vmem:[%s1693_s8] ss:$0 sm:$0xff] }
 0x1ad   : > { %1424 = vrcp.f32 %v746_v16 }
 0x1ae   : > { %1426 = vrcp.f32 %v1458_v45 }
 0x1b1   : > { %v1421_v15 = vpop.eup %1420 }
 0x1b2   : > { %v1423_v17 = vpop.eup %1422  ;;  %v832_v18 = vmul.f32 %v1421_v15, %v767_v6 }
 0x1b3   : > { %v805_v19 = vpop.f32.mrf.mxu2  ;;  %v1425_v23 = vpop.eup %1424 }
 0x1b4   : > { %v834_v20 = vmul.f32 %v1423_v17, %v805_v19  ;;  %v836_v21 = vpack.c.bf16 %v832_v18, %v832_v18  ;;  %v1427_v46 = vpop.eup %1426  ;;  %v1375_v18 = vld [vmem:[%s1696_s11 + $0x28] sm:$0xff]  ;;  %v1374_v19 = vld [vmem:[%s1696_s11 + $0x20] sm:$0xff] }
 0x1b5   : > { %v940_v47 = vmul.f32 32.0, %v1427_v46  ;;  %vm944_vm3 = vweird.f32 %v1427_v46  ;;  %1095 = vmatpush.bf16.msra.mxu1 %v1375_v18 }
 0x1b6   : > { %v838_v22 = vpack.c.bf16 %v834_v20, %v834_v20  ;;  %1315 = vmatmul.msk.bf16.vlgmr.msra.gmra.mxu0 %vm634_vm0, %v836_v21  ;;  %v1373_v20 = vld [vmem:[%s1696_s11 + $0x18] sm:$0xff]  ;;  %v1372_v21 = vld [vmem:[%s1696_s11 + $0x10] sm:$0xff] }
 0x1b7   : > { %v941_v48 = vsub.f32 1.0, %v940_v47 }
 0x1b8   : > { %1319 = vmatmul.msk.bf16.vlgmr.msrb.gmra.mxu2 %vm634_vm0, %v838_v22  ;;  %v1371_v22 = vld [vmem:[%s1696_s11 + $0x8] sm:$0xff] }
 0x1b9   : > { %v942_v49 = vmul.f32 %v1427_v46, %v941_v48  ;;  %1096 = vmatpush.bf16.msra.mxu1 %v1374_v19 }
 0x1bb   : > { %v807_v24 = vpop.f32.mrf.mxu2  ;;  %v824_v25 = vpop.f32.mrf.mxu3  ;;  %v943_v50 = vadd.f32 %v1427_v46, %v942_v49 }
 0x1bc   : > { %v835_v26 = vmul.f32 %v1425_v23, %v824_v25  ;;  %v1370_v23 = vld [vmem:[%s1696_s11] sm:$0xff]  ;;  %v1459_v24 = vmov 0.0  }
 0x1bd   : > { %v945_v51 = vsel %vm944_vm3, %v1427_v46, %v943_v50  ;;  %1097 = vmatpush.bf16.msra.mxu1 %v1373_v20  ;;  %979 = vst.msk [vmem:[#allocation4] sm:$0xff] %vm932_vm2, %v1459_v24  ;;  %v1408_v25 = vld [vmem:[%s1695_s10] ss:$0 sm:$0xff] }
 0x1be   : > { %v839_v27 = vpack.c.bf16 %v835_v26, %v835_v26 }
 0x1c0   : > { %1321 = vmatmul.msk.bf16.vlgmr.msra.gmra.mxu3 %vm634_vm0, %v839_v27 }
 0x1c1   : > { %1098 = vmatpush.bf16.msra.mxu1 %v1372_v21 }
 0x1c3   : > { %v826_v28 = vpop.f32.mrf.mxu3 }
 0x1c5   : > { %1099 = vmatpush.bf16.msra.mxu1 %v1371_v22 }
 0x1c9   : > { %1100 = vmatpush.bf16.msra.mxu1 %v1370_v23 }
 0x221   : > { %v882_v29 = vpop.f32.mrf.mxu1 }
 0x229   : > { %v884_v30 = vpop.f32.mrf.mxu1 }
 0x233   : > { %v857_v31 = vpop.f32.mrf.mxu0 }
 0x234   : > { %v864_v34 = vadd.f32 %v1405_v32, %v857_v31 }
 0x236   : > { %v886_v36 = vadd.f32 %v882_v29, %v864_v34 }
 0x23b   : > { %v904_v33 = vpop.f32.mrf.mxu2  ;;  %v859_v35 = vpop.f32.mrf.mxu0 }
 0x23c   : > { %v908_v37 = vadd.f32 %v904_v33, %v886_v36 }
 0x243   : > { %v906_v38 = vpop.f32.mrf.mxu2  ;;  %v926_v40 = vpop.f32.mrf.mxu3 }
 0x244   : > { %v930_v41 = vadd.f32 %v926_v40, %v908_v37 }
 0x246   : > { %v931_v42 = vadd.f32 %v930_v41, %v617_v39  ;;  %v1027_v39 = vld [vmem:[#allocation4] sm:$0xff] }
 0x248   : > { %933 = vst.msk [vmem:[#allocation2] sm:$0xff] %vm932_vm2, %v931_v42  ;;  %v936_v43 = vsel %vm932_vm2, %v931_v42, 0.0 }
 0x249   : > { %937 = vadd.xlane.f32.xlu2 %v936_v43  ;;  %v1409_v43 = vld [vmem:[%s1697_s12] ss:$0 sm:$0xff] }
 0x24b   : > { %v928_v44 = vpop.f32.mrf.mxu3 }
 0x24f   : > { %v1111_v44 = vld [vmem:[#allocation2] sm:$0xff] }
 0x2bc   : > { %v938_v52 = vpop.xlane.xlu2 %937 }
 0x2bd   : > { %v946_v53 = vmul.f32 %v945_v51, %v938_v52 }
 0x2bf   : > { %v947_v54 = vsub.f32 %v931_v42, %v946_v53 }
 0x2c1   : > { %v948_v55 = vmul.f32 %v947_v54, %v947_v54  ;;  %v970_v11 = vmul.f32 %v1406_v10, %v947_v54 }
 0x2c3   : > { %v949_v56 = vsel %vm932_vm2, %v948_v55, 0.0 }
 0x2c4   : > { %950 = vadd.xlane.f32.xlu0 %v949_v56 }
 0x337   : > { %v951_v57 = vpop.xlane.xlu0 %950 }
 0x338   : > { %v952_v58 = vmul.f32 0.032258064, %v951_v57 }
 0x33a   : > { %1428 = vrsqrt.f32 %v952_v58  ;;  %vm960_vm4 = vcmp.eq.f32.partialorder %v952_v58, inf  ;;  %v963_v6 = vand.u32 2147483648, %v952_v58  ;;  %vm962_vm5 = vcmp.eq.f32.partialorder %v952_v58, 0.0 }
 0x340   : > { %v1429_v61 = vpop.eup %1428 }
 0x341   : > { %v954_v62 = vmul.f32 %v1429_v61, %v952_v58 }
 0x343   : > { %v955_v63 = vmul.f32 %v1429_v61, %v954_v62 }
 0x345   : > { %v956_v0 = vmul.f32 0.5, %v955_v63 }
 0x347   : > { %v957_v2 = vsub.f32 1.5, %v956_v0 }
 0x349   : > { %v958_v4 = vmul.f32 %v1429_v61, %v957_v2 }
 0x34b   : > { %v959_v5 = vmul.f32 %v958_v4, %v952_v58 }
 0x34d   : > { %v961_v7 = vsel %vm960_vm4, %v952_v58, %v959_v5 }
 0x34e   : > { %v964_v8 = vsel %vm962_vm5, %v963_v6, %v961_v7 }
 0x34f   : > { %v965_v9 = vadd.f32 1e-06, %v964_v8 }
 0x351   : > { %1430 = vrcp.f32 %v965_v9 }
 0x357   : > { %v1431_v13 = vpop.eup %1430 }
 0x358   : > { %v971_v14 = vmul.f32 %v1431_v13, %v970_v11 }
 0x35a   : > { %v975_v15 = vadd.f32 %v1407_v12, %v971_v14 }
 0x35c   : > { %v976_v16 = vpack.c.bf16 %v975_v15, %v975_v15 }
 0x35e   : > { %978 = vst.msk [vmem:[#allocation3] sm:$0xf] %vm977_vm6, %v976_v16 }
 0x365   : > { %v980_v17 = vld [vmem:[#allocation3] sm:$0xf] }
 0x366   : > { %1330 = vmatmul.msk.bf16.vlgmr.msrb.gmra.mxu0 %vm932_vm2, %v980_v17 }
 0x3e3   : > { %v1014_v26 = vpop.f32.mrf.mxu0 }
 0x3e4   : > { %v1015_v27 = vadd.f32 %v1408_v25, %v1014_v26 }
 0x3e6   : > { %v1019_v28 = vmul.f32 0.044715, %v1015_v27  ;;  %v1018_v35 = vmul.f32 0.5, %v1015_v27 }
 0x3e8   : > { %v1020_v29 = vmul.f32 %v1019_v28, %v1015_v27 }
 0x3ea   : > { %v1021_v30 = vmul.f32 %v1020_v29, %v1015_v27 }
 0x3eb   : > { %v1016_v31 = vpop.f32.mrf.mxu0 }
 0x3ec   : > { %v1022_v32 = vadd.f32 %v1021_v30, %v1015_v27 }
 0x3ee   : > { %v1023_v33 = vmul.f32 0.7978846, %v1022_v32 }
 0x3f0   : > { %1432 = vtanh.f32 %v1023_v33 }
 0x3f6   : > { %v1433_v34 = vpop.eup %1432 }
 0x3f7   : > { %v1025_v36 = vadd.f32 1.0, %v1433_v34 }
 0x3f9   : > { %v1026_v37 = vmul.f32 %v1025_v36, %v1018_v35 }
 0x3fb   : > { %v1028_v38 = vpack.c.bf16 %v1026_v37, %v1026_v37 }
 0x3fd   : > { %1101 = vmatmul.bf16.vlgmr.msra.gmra.mxu1 %v1028_v38 }
 0x47a   : > { %v1102_v40 = vpop.f32.mrf.mxu1 }
 0x47b   : > { %v1106_v41 = vadd.f32 %v1102_v40, %v1027_v39 }
 0x47d   : > { %1107 = vst.msk [vmem:[#allocation4] sm:$0xff] %vm932_vm2, %v1106_v41 }
 0x482   : > { %v1104_v42 = vpop.f32.mrf.mxu1 }
 0x484   : > { %v1112_v45 = vld [vmem:[#allocation4] sm:$0xff] }
 0x485   : > { %v1113_v46 = vadd.f32 %v1112_v45, %v1111_v44 }
 0x487   : > { %v1118_v47 = vadd.f32 %v1409_v43, %v1113_v46 }
 0x489   : > { %1119 = vst.msk [vmem:[%s611_s19] sm:$0xff] %vm932_vm2, %v1118_v47 }
 0x48a PF: > { %s23_s27 = sadd.s32 1, %s1456_s27   ;;  %s1699_s25 = smov %s1452_s26 }
 0x48b   : > { %p20_p5 = scmp.ge.s32.totalorder %s23_s27, 4   ;;  %s1700_s26 = smov %s1702_s28 }
 0x48d   :  { %22 = sbr.rel (!%p20_p5) target bundleno = 2 (0x2), region = 134 }

</bundles_post_ra>
